<compile_context>
chip_gen: v7x
topology: tpu7x:2x2x1
jax: 0.10.0
libtpu: 0.0.40
codegen_flags: <defaults>
</compile_context>

<pallas_src>
import jax
import jax.numpy as jnp
from jax.experimental import pallas as pl
from jax.experimental.pallas import tpu as pltpu


H1, H1P = 400, 512   # l1 width, padded to a multiple of 128
H2, H2P = 300, 384   # l2/l5 width, padded to a multiple of 128
NEG_MASK = -1e30     # logit value for padded rep columns (baked into b6)


def _round_up(x, m):
    return ((x + m - 1) // m) * m


def _actor_kernel(ma_ref,                 # (1,1) f32 in SMEM: max_action
                  state_ref,              # (TB, S) f32          (pipelined)
                  w1_ref, b1_ref,         # (S, H1P) bf16, (1, H1P) f32
                  w25_ref, b25_ref,       # (H1P, 2*H2P) bf16, (1, 2*H2P) f32  (w2 | w5)
                  w3_ref, b3_ref,         # (H2P, A_pad) bf16, (1, A_pad) f32
                  w6_ref, b6_ref,         # (H2P, R_pad) bf16, (1, R_pad) f32 (pad cols = -1e30)
                  out_ref):               # (TB, A_pad + R_pad) f32   [action | logp]
    ma = ma_ref[0, 0]

    # All matmuls run natively on the MXU in bf16 with f32 accumulation.
    x = state_ref[...].astype(jnp.bfloat16)                          # [TB, S]

    # shared = relu(l1(state)); padded H1 columns stay exactly 0.
    shared = jnp.dot(x, w1_ref[...], preferred_element_type=jnp.float32)
    shared = jnp.maximum(shared + b1_ref[...], 0.0)                  # [TB, H1P] f32

    # Fused l2|l5 matmul over the same (bf16) LHS, lane-aligned split afterwards.
    ar = jnp.dot(shared.astype(jnp.bfloat16), w25_ref[...],
                 preferred_element_type=jnp.float32)
    ar = jnp.maximum(ar + b25_ref[...], 0.0)                         # [TB, 2*H2P] f32
    h2p = w3_ref.shape[0]
    a = ar[:, :h2p].astype(jnp.bfloat16)                             # relu(l2(shared))
    r = ar[:, h2p:].astype(jnp.bfloat16)                             # relu(l5(shared))

    # Action head: max_action * tanh(l3(a)).
    act = jnp.dot(a, w3_ref[...], preferred_element_type=jnp.float32) + b3_ref[...]
    act = ma * jnp.tanh(act)                                         # [TB, A_pad]

    # Repetition head: log_softmax(l6(r), dim=1).  Padded columns get logit
    # -1e30 straight from the packed bias, so no in-kernel iota/mask is needed;
    # exp(-1e30 - m) underflows to 0 and cannot perturb the logsumexp.
    logits = jnp.dot(r, w6_ref[...], preferred_element_type=jnp.float32) + b6_ref[...]
    m = jnp.max(logits, axis=1, keepdims=True)
    z = logits - m
    lse = jnp.log(jnp.sum(jnp.exp(z), axis=1, keepdims=True))
    logp = z - lse                                                   # [TB, R_pad]

    a_pad = b3_ref.shape[1]
    out_ref[:, :a_pad] = act.astype(out_ref.dtype)
    out_ref[:, a_pad:] = logp.astype(out_ref.dtype)


def pack_params(params, state_dim, action_dim, rep_dim):
    """Pad to lane-aligned output widths, fuse w2|w5, bake the rep-pad mask into
    b6, and cast weights to bf16 (biases stay f32).  state_dim is NOT padded."""
    ap = _round_up(action_dim, 128)
    rp = _round_up(rep_dim, 128)

    def pad2(w, shape):
        return jnp.zeros(shape, jnp.float32).at[:w.shape[0], :w.shape[1]].set(w)

    w25 = jnp.zeros((H1P, 2 * H2P), jnp.float32)
    w25 = w25.at[:H1, :H2].set(params["w2"]).at[:H1, H2P:H2P + H2].set(params["w5"])
    b25 = jnp.zeros((1, 2 * H2P), jnp.float32)
    b25 = b25.at[:, :H2].set(params["b2"]).at[:, H2P:H2P + H2].set(params["b5"])

    # Padded logit columns: w6 cols are 0, bias is -1e30  =>  logits_pad == -1e30.
    b6 = jnp.full((1, rp), NEG_MASK, jnp.float32).at[:, :rep_dim].set(params["b6"])

    return {
        "w1": pad2(params["w1"], (state_dim, H1P)).astype(jnp.bfloat16),
        "b1": pad2(params["b1"], (1, H1P)),
        "w25": w25.astype(jnp.bfloat16),
        "b25": b25,
        "w3": pad2(params["w3"], (H2P, ap)).astype(jnp.bfloat16),
        "b3": pad2(params["b3"], (1, ap)),
        "w6": pad2(params["w6"], (H2P, rp)).astype(jnp.bfloat16),
        "b6": b6,
    }


def actor_forward(state, packed, max_action, action_dim, rep_dim, batch_tile=512):
    """state: [B, state_dim] f32. packed: output of pack_params. Returns (action, log_probs)."""
    B, S = state.shape
    assert packed["w1"].shape[0] == S, "packed params built for a different state_dim"
    h1p = packed["w1"].shape[1]
    h2p, ap = packed["w3"].shape
    rp = packed["w6"].shape[1]

    # Batch tiling:
    #   * rows rounded to the f32 sublane (8);
    #   * per-step tile capped at `batch_tile` (amortizes the ~0.35us/step
    #     pipeline overhead while staying far under VMEM limits);
    #   * tile additionally capped so the grid has >= 2 steps whenever the batch
    #     allows it, letting the "parallel" axis shard across both v7x TCs.
    b8 = _round_up(B, 8)
    TB = min(batch_tile, b8)
    if b8 > 8:
        TB = min(TB, _round_up((b8 + 1) // 2, 8))
    Bp = _round_up(B, TB)
    grid = (Bp // TB,)

    x = state.astype(jnp.float32)
    if Bp != B:
        x = jnp.pad(x, ((0, Bp - B), (0, 0)))   # row-pad only; state_dim kept as-is

    ma = jnp.full((1, 1), max_action, jnp.float32)

    def const_spec(shape):
        # Constant index_map -> block DMA'd once and resident in VMEM across the grid.
        return pl.BlockSpec(shape, lambda i: (0, 0))

    out = pl.pallas_call(
        _actor_kernel,
        out_shape=jax.ShapeDtypeStruct((Bp, ap + rp), jnp.float32),
        grid=grid,
        in_specs=[
            pl.BlockSpec(memory_space=pltpu.MemorySpace.SMEM),      # max_action scalar
            pl.BlockSpec((TB, S), lambda i: (i, 0)),                # state (pipelined)
            const_spec((S, h1p)), const_spec((1, h1p)),
            const_spec((h1p, 2 * H2P)), const_spec((1, 2 * H2P)),
            const_spec((h2p, ap)), const_spec((1, ap)),
            const_spec((h2p, rp)), const_spec((1, rp)),
        ],
        out_specs=pl.BlockSpec((TB, ap + rp), lambda i: (i, 0)),
        compiler_params=pltpu.CompilerParams(
            dimension_semantics=("parallel",)),
    )(ma, x,
      packed["w1"], packed["b1"],
      packed["w25"], packed["b25"],
      packed["w3"], packed["b3"],
      packed["w6"], packed["b6"])

    action = out[:B, :action_dim]
    log_probs = out[:B, ap:ap + rep_dim]
    return action, log_probs


def init_params(key, state_dim, action_dim, rep_dim):
    """Deterministic synthetic init; weights stored as (in, out), biases as (1, out)."""
    dims = {
        "1": (state_dim, H1),
        "2": (H1, H2),
        "3": (H2, action_dim),
        "5": (H1, H2),
        "6": (H2, rep_dim),
    }
    params = {}
    for name, (fan_in, fan_out) in dims.items():
        key, kw, kb = jax.random.split(key, 3)
        bound = 1.0 / jnp.sqrt(fan_in)  # matches PyTorch Linear default init range
        params[f"w{name}"] = jax.random.uniform(
            kw, (fan_in, fan_out), jnp.float32, -bound, bound)
        params[f"b{name}"] = jax.random.uniform(
            kb, (1, fan_out), jnp.float32, -bound, bound)
    return params


if __name__ == "__main__":
    B, state_dim, action_dim, rep_dim = 2, 16, 4, 8
    max_action = 2.0

    key = jax.random.PRNGKey(0)
    key, kx = jax.random.split(key)
    state = jax.random.normal(kx, (B, state_dim), dtype=jnp.float32)
    params = init_params(key, state_dim, action_dim, rep_dim)
    packed = pack_params(params, state_dim, action_dim, rep_dim)

    act, logp = actor_forward(state, packed, max_action, action_dim, rep_dim)
    jax.block_until_ready((act, logp))

    # Reference that mirrors the kernel's precision contract:
    # bf16 weights and bf16 matmul inputs, f32 accumulation / biases / activations.
    def mm(x, w):
        return jnp.dot(x.astype(jnp.bfloat16), w.astype(jnp.bfloat16),
                       preferred_element_type=jnp.float32)

    shared_ref = jnp.maximum(mm(state, params["w1"]) + params["b1"], 0.0)
    a_ref = jnp.maximum(mm(shared_ref, params["w2"]) + params["b2"], 0.0)
    r_ref = jnp.maximum(mm(shared_ref, params["w5"]) + params["b5"], 0.0)
    act_ref = max_action * jnp.tanh(mm(a_ref, params["w3"]) + params["b3"])
    logp_ref = jax.nn.log_softmax(mm(r_ref, params["w6"]) + params["b6"], axis=1)

    assert act.shape == (B, action_dim) and logp.shape == (B, rep_dim)
    assert jnp.allclose(act, act_ref, atol=1e-2), "action head mismatch"
    assert jnp.allclose(logp, logp_ref, atol=1e-2), "log_softmax head mismatch"

    print("KERNEL_OK")
</pallas_src>

<mosaic_0001>
module attributes {stable_mosaic.version = 11 : i64} {
  func.func @_actor_kernel(%arg0: i32, %arg1: memref<1x1xf32, #tpu.memory_space<smem>>, %arg2: memref<8x16xf32, #tpu.memory_space<vmem>>, %arg3: memref<16x512xbf16, #tpu.memory_space<vmem>>, %arg4: memref<1x512xf32, #tpu.memory_space<vmem>>, %arg5: memref<512x768xbf16, #tpu.memory_space<vmem>>, %arg6: memref<1x768xf32, #tpu.memory_space<vmem>>, %arg7: memref<384x128xbf16, #tpu.memory_space<vmem>>, %arg8: memref<1x128xf32, #tpu.memory_space<vmem>>, %arg9: memref<384x128xbf16, #tpu.memory_space<vmem>>, %arg10: memref<1x128xf32, #tpu.memory_space<vmem>>, %arg11: memref<8x256xf32, #tpu.memory_space<vmem>>) attributes {dimension_semantics = [#tpu.dimension_semantics<parallel>], iteration_bounds = array<i64: 1>, scalar_prefetch = 0 : i64, scratch_operands = 0 : i64, tpu.core_type = #tpu.core_type<tc>, window_params = [{transform_indices = @transform_0, window_bounds = array<i64: 1, 1>}, {transform_indices = @transform_1, window_bounds = array<i64: 8, 16>}, {pipeline_mode = #tpu.pipeline_mode<synchronous>, transform_indices = @transform_2, window_bounds = array<i64: 16, 512>}, {pipeline_mode = #tpu.pipeline_mode<synchronous>, transform_indices = @transform_3, window_bounds = array<i64: 1, 512>}, {pipeline_mode = #tpu.pipeline_mode<synchronous>, transform_indices = @transform_4, window_bounds = array<i64: 512, 768>}, {pipeline_mode = #tpu.pipeline_mode<synchronous>, transform_indices = @transform_5, window_bounds = array<i64: 1, 768>}, {pipeline_mode = #tpu.pipeline_mode<synchronous>, transform_indices = @transform_6, window_bounds = array<i64: 384, 128>}, {pipeline_mode = #tpu.pipeline_mode<synchronous>, transform_indices = @transform_7, window_bounds = array<i64: 1, 128>}, {pipeline_mode = #tpu.pipeline_mode<synchronous>, transform_indices = @transform_8, window_bounds = array<i64: 384, 128>}, {pipeline_mode = #tpu.pipeline_mode<synchronous>, transform_indices = @transform_9, window_bounds = array<i64: 1, 128>}, {transform_indices = @transform_10, window_bounds = array<i64: 8, 256>}]} {
    %c0 = arith.constant 0 : index
    %c0_0 = arith.constant 0 : index
    %0 = memref.load %arg1[%c0, %c0_0] : memref<1x1xf32, #tpu.memory_space<smem>>
    %c0_1 = arith.constant 0 : index
    %c0_2 = arith.constant 0 : index
    %1 = vector.load %arg2[%c0_1, %c0_2] : memref<8x16xf32, #tpu.memory_space<vmem>>, vector<8x16xf32>
    %2 = arith.truncf %1 : vector<8x16xf32> to vector<8x16xbf16>
    %c0_3 = arith.constant 0 : index
    %c0_4 = arith.constant 0 : index
    %3 = vector.load %arg3[%c0_3, %c0_4] : memref<16x512xbf16, #tpu.memory_space<vmem>>, vector<16x512xbf16>
    %cst = arith.constant dense<0.000000e+00> : vector<8x512xf32>
    %4 = tpu.matmul %2, %3, %cst {dimension_numbers = #tpu.dot_dimension_numbers<[1], [0], [0], [1], [0, 0, 1, 1], [], []>} : vector<8x16xbf16>, vector<16x512xbf16>, vector<8x512xf32> -> vector<8x512xf32>
    %c0_5 = arith.constant 0 : index
    %c0_6 = arith.constant 0 : index
    %5 = vector.load %arg4[%c0_5, %c0_6] : memref<1x512xf32, #tpu.memory_space<vmem>>, vector<1x512xf32>
    %6 = vector.broadcast %5 : vector<1x512xf32> to vector<8x512xf32>
    %7 = arith.addf %4, %6 : vector<8x512xf32>
    %cst_7 = arith.constant 0.000000e+00 : f32
    %8 = vector.broadcast %cst_7 : f32 to vector<8x512xf32>
    %9 = arith.maximumf %7, %8 : vector<8x512xf32>
    %10 = arith.truncf %9 : vector<8x512xf32> to vector<8x512xbf16>
    %c0_8 = arith.constant 0 : index
    %c0_9 = arith.constant 0 : index
    %11 = vector.load %arg5[%c0_8, %c0_9] : memref<512x768xbf16, #tpu.memory_space<vmem>>, vector<512x768xbf16>
    %cst_10 = arith.constant dense<0.000000e+00> : vector<8x768xf32>
    %12 = tpu.matmul %10, %11, %cst_10 {dimension_numbers = #tpu.dot_dimension_numbers<[1], [0], [0], [1], [0, 0, 1, 1], [], []>} : vector<8x512xbf16>, vector<512x768xbf16>, vector<8x768xf32> -> vector<8x768xf32>
    %c0_11 = arith.constant 0 : index
    %c0_12 = arith.constant 0 : index
    %13 = vector.load %arg6[%c0_11, %c0_12] : memref<1x768xf32, #tpu.memory_space<vmem>>, vector<1x768xf32>
    %14 = vector.broadcast %13 : vector<1x768xf32> to vector<8x768xf32>
    %15 = arith.addf %12, %14 : vector<8x768xf32>
    %cst_13 = arith.constant 0.000000e+00 : f32
    %16 = vector.broadcast %cst_13 : f32 to vector<8x768xf32>
    %17 = arith.maximumf %15, %16 : vector<8x768xf32>
    %18 = vector.extract_strided_slice %17 {offsets = [0, 0], sizes = [8, 384], strides = [1, 1]} : vector<8x768xf32> to vector<8x384xf32>
    %19 = arith.truncf %18 : vector<8x384xf32> to vector<8x384xbf16>
    %20 = vector.extract_strided_slice %17 {offsets = [0, 384], sizes = [8, 384], strides = [1, 1]} : vector<8x768xf32> to vector<8x384xf32>
    %21 = arith.truncf %20 : vector<8x384xf32> to vector<8x384xbf16>
    %c0_14 = arith.constant 0 : index
    %c0_15 = arith.constant 0 : index
    %22 = vector.load %arg7[%c0_14, %c0_15] : memref<384x128xbf16, #tpu.memory_space<vmem>>, vector<384x128xbf16>
    %cst_16 = arith.constant dense<0.000000e+00> : vector<8x128xf32>
    %23 = tpu.matmul %19, %22, %cst_16 {dimension_numbers = #tpu.dot_dimension_numbers<[1], [0], [0], [1], [0, 0, 1, 1], [], []>} : vector<8x384xbf16>, vector<384x128xbf16>, vector<8x128xf32> -> vector<8x128xf32>
    %c0_17 = arith.constant 0 : index
    %c0_18 = arith.constant 0 : index
    %24 = vector.load %arg8[%c0_17, %c0_18] : memref<1x128xf32, #tpu.memory_space<vmem>>, vector<1x128xf32>
    %25 = vector.broadcast %24 : vector<1x128xf32> to vector<8x128xf32>
    %26 = arith.addf %23, %25 : vector<8x128xf32>
    %27 = math.tanh %26 : vector<8x128xf32>
    %28 = vector.broadcast %0 : f32 to vector<8x128xf32>
    %29 = arith.mulf %28, %27 : vector<8x128xf32>
    %c0_19 = arith.constant 0 : index
    %c0_20 = arith.constant 0 : index
    %30 = vector.load %arg9[%c0_19, %c0_20] : memref<384x128xbf16, #tpu.memory_space<vmem>>, vector<384x128xbf16>
    %cst_21 = arith.constant dense<0.000000e+00> : vector<8x128xf32>
    %31 = tpu.matmul %21, %30, %cst_21 {dimension_numbers = #tpu.dot_dimension_numbers<[1], [0], [0], [1], [0, 0, 1, 1], [], []>} : vector<8x384xbf16>, vector<384x128xbf16>, vector<8x128xf32> -> vector<8x128xf32>
    %c0_22 = arith.constant 0 : index
    %c0_23 = arith.constant 0 : index
    %32 = vector.load %arg10[%c0_22, %c0_23] : memref<1x128xf32, #tpu.memory_space<vmem>>, vector<1x128xf32>
    %33 = vector.broadcast %32 : vector<1x128xf32> to vector<8x128xf32>
    %34 = arith.addf %31, %33 : vector<8x128xf32>
    %cst_24 = arith.constant dense<0xFF800000> : vector<8xf32>
    %35 = vector.multi_reduction <maximumf>, %34, %cst_24 [1] : vector<8x128xf32> to vector<8xf32>
    %36 = vector.shape_cast %35 : vector<8xf32> to vector<8x1xf32>
    %37 = vector.broadcast %36 : vector<8x1xf32> to vector<8x128xf32>
    %38 = arith.subf %34, %37 : vector<8x128xf32>
    %39 = math.exp %38 : vector<8x128xf32>
    %cst_25 = arith.constant dense<0.000000e+00> : vector<8xf32>
    %40 = vector.multi_reduction <add>, %39, %cst_25 [1] : vector<8x128xf32> to vector<8xf32>
    %41 = vector.shape_cast %40 : vector<8xf32> to vector<8x1xf32>
    %42 = math.log %41 : vector<8x1xf32>
    %43 = vector.broadcast %42 : vector<8x1xf32> to vector<8x128xf32>
    %44 = arith.subf %38, %43 : vector<8x128xf32>
    %c0_26 = arith.constant 0 : index
    %c0_27 = arith.constant 0 : index
    %45 = vector.load %arg11[%c0_26, %c0_27] : memref<8x256xf32, #tpu.memory_space<vmem>>, vector<8x128xf32>
    tpu.vector_store %arg11[%c0_26, %c0_27], %29 {strides = array<i32>} : memref<8x256xf32, #tpu.memory_space<vmem>>, vector<8x128xf32>,
    %c0_28 = arith.constant 0 : index
    %c128 = arith.constant 128 : index
    %46 = vector.load %arg11[%c0_28, %c128] : memref<8x256xf32, #tpu.memory_space<vmem>>, vector<8x128xf32>
    tpu.vector_store %arg11[%c0_28, %c128], %44 {strides = array<i32>} : memref<8x256xf32, #tpu.memory_space<vmem>>, vector<8x128xf32>,
    return
  }
  func.func @transform_0(%arg0: i32) -> (i32, i32) {
    %c0_i32 = arith.constant 0 : i32
    %c0_i32_0 = arith.constant 0 : i32
    %c0_i32_1 = arith.constant 0 : i32
    return %c0_i32, %c0_i32_0 : i32, i32
  }
  func.func @transform_1(%arg0: i32) -> (i32, i32) {
    %c0_i32 = arith.constant 0 : i32
    %c0_i32_0 = arith.constant 0 : i32
    return %arg0, %c0_i32 : i32, i32
  }
  func.func @transform_2(%arg0: i32) -> (i32, i32) {
    %c0_i32 = arith.constant 0 : i32
    %c0_i32_0 = arith.constant 0 : i32
    %c0_i32_1 = arith.constant 0 : i32
    return %c0_i32, %c0_i32_0 : i32, i32
  }
  func.func @transform_3(%arg0: i32) -> (i32, i32) {
    %c0_i32 = arith.constant 0 : i32
    %c0_i32_0 = arith.constant 0 : i32
    %c0_i32_1 = arith.constant 0 : i32
    return %c0_i32, %c0_i32_0 : i32, i32
  }
  func.func @transform_4(%arg0: i32) -> (i32, i32) {
    %c0_i32 = arith.constant 0 : i32
    %c0_i32_0 = arith.constant 0 : i32
    %c0_i32_1 = arith.constant 0 : i32
    return %c0_i32, %c0_i32_0 : i32, i32
  }
  func.func @transform_5(%arg0: i32) -> (i32, i32) {
    %c0_i32 = arith.constant 0 : i32
    %c0_i32_0 = arith.constant 0 : i32
    %c0_i32_1 = arith.constant 0 : i32
    return %c0_i32, %c0_i32_0 : i32, i32
  }
  func.func @transform_6(%arg0: i32) -> (i32, i32) {
    %c0_i32 = arith.constant 0 : i32
    %c0_i32_0 = arith.constant 0 : i32
    %c0_i32_1 = arith.constant 0 : i32
    return %c0_i32, %c0_i32_0 : i32, i32
  }
  func.func @transform_7(%arg0: i32) -> (i32, i32) {
    %c0_i32 = arith.constant 0 : i32
    %c0_i32_0 = arith.constant 0 : i32
    %c0_i32_1 = arith.constant 0 : i32
    return %c0_i32, %c0_i32_0 : i32, i32
  }
  func.func @transform_8(%arg0: i32) -> (i32, i32) {
    %c0_i32 = arith.constant 0 : i32
    %c0_i32_0 = arith.constant 0 : i32
    %c0_i32_1 = arith.constant 0 : i32
    return %c0_i32, %c0_i32_0 : i32, i32
  }
  func.func @transform_9(%arg0: i32) -> (i32, i32) {
    %c0_i32 = arith.constant 0 : i32
    %c0_i32_0 = arith.constant 0 : i32
    %c0_i32_1 = arith.constant 0 : i32
    return %c0_i32, %c0_i32_0 : i32, i32
  }
  func.func @transform_10(%arg0: i32) -> (i32, i32) {
    %c0_i32 = arith.constant 0 : i32
    %c0_i32_0 = arith.constant 0 : i32
    return %arg0, %c0_i32 : i32, i32
  }
}

</mosaic_0001>

<bundles_post_ra>
// kernel: tpu_custom_call.1
= control target key start
LH: loop header
LB: loop body
LE: loop exit
PB: predicated region body
PF: predicated region fallthrough
CT: control target
= control target key end

     0   :  { %16 = vsyncpa [#allocation4], 0  ;;  %s3404_s0 = inlined_call_operand.<no memory space> [shape: f32[1,1], index: 0, kind: input, shape index: {}]   ;;  %s3405_s1 = inlined_call_operand.hbm [shape: f32[8,16], index: 1, kind: input, shape index: {}]   ;;  %s3406_s2 = inlined_call_operand.hbm [shape: bf16[16,512], index: 2, kind: input, shape index: {}]   ;;  %s3407_s3 = inlined_call_operand.vmem [shape: f32[1,512], index: 3, kind: input, shape index: {}]   ;;  %s3408_s4 = inlined_call_operand.hbm [shape: bf16[512,768], index: 4, kind: input, shape index: {}]   ;;  %s3409_s5 = inlined_call_operand.vmem [shape: f32[1,768], index: 5, kind: input, shape index: {}]   ;;  %s3410_s6 = inlined_call_operand.hbm [shape: bf16[384,128], index: 6, kind: input, shape index: {}]   ;;  %s3411_s7 = inlined_call_operand.vmem [shape: f32[1,128], index: 7, kind: input, shape index: {}]   ;;  %s3412_s8 = inlined_call_operand.hbm [shape: bf16[384,128], index: 8, kind: input, shape index: {}]   ;;  %s3413_s9 = inlined_call_operand.vmem [shape: f32[1,128], index: 9, kind: input, shape index: {}]   ;;  %s3414_s10 = inlined_call_operand.hbm [shape: f32[8,256], index: 10, kind: output, shape index: {}]  }
   0x1   :  { %17 = vsyncpa [#allocation7], 0 }
   0x2   :  { %18 = vsyncpa [#allocation10], 0 }
   0x3   :  { %19 = vsyncpa [#allocation5], 0  ;;  %s3150_s13 = smov [#allocation6]   ;;  %s3010_s17 = scalar_lea.hbm %s3406_s2, 512 }
   0x4   :  { %s37_s14 = sshll.u32 %s3150_s13, 4  ;;  %p3011_p0 = scmp.ne.s32.totalorder %s3406_s2, %s3010_s17  ;;  %s38_s14 = int_to_ptr.vmem [resolvable:$true] %s37_s14 }
   0x5   :  { %p3014_p1 = scmp.lt.u32.totalorder %s3010_s17, %s3406_s2 }
   0x7   :  { %p3016_p2 = pnand %p3014_p1, %p3011_p0 }
   0x9   :  { %3019 = shalt.err (!%p3016_p2)
}
   0xa   :  { %s3020_s22 = scalar_lea.vmem %s38_s14, 512  ;;  %p3025_p4 = scmp.lt.s32.totalorder %s38_s14, %s38_s14 }
   0xb   :  { %p3021_p3 = scmp.ne.s32.totalorder %s38_s14, %s3020_s22  ;;  %p3026_p5 = scmp.lt.s32.totalorder %s3020_s22, %s3020_s22 }
   0xd   :  { %p3027_p6 = por %p3026_p5, %p3025_p4 }
   0xf   :  { %p3028_p7 = pnand %p3027_p6, %p3021_p3 }
  0x11   :  { %3031 = shalt.err (!%p3028_p7)
}
  0x12   :  { %s3151_s23 = smov 256   ;;  %s3152_s24 = smov 16  }
  0x13   :  { %43 = dma.hbm_to_vmem [thread:$0]  %s3406_s2, 512, %s38_s14, [#allocation7], %s3151_s23, %s3151_s23, %s3152_s24  }
  0x14   :  { %s3153_s27 = smov [#allocation9]   ;;  %s3032_s11 = scalar_lea.hbm %s3410_s6, 3072 }
  0x15   :  { %s65_s28 = sshll.u32 %s3153_s27, 4  ;;  %p3033_p8 = scmp.ne.s32.totalorder %s3410_s6, %s3032_s11  ;;  %s66_s28 = int_to_ptr.vmem [resolvable:$true] %s65_s28 }
  0x16   :  { %p3036_p9 = scmp.lt.u32.totalorder %s3032_s11, %s3410_s6 }
  0x18   :  { %p3038_p10 = pnand %p3036_p9, %p3033_p8 }
  0x1a   :  { %3041 = shalt.err (!%p3038_p10)
}
  0x1b   :  { %s3042_s17 = scalar_lea.vmem %s66_s28, 3072  ;;  %p3047_p12 = scmp.lt.s32.totalorder %s66_s28, %s66_s28 }
  0x1c   :  { %p3043_p11 = scmp.ne.s32.totalorder %s66_s28, %s3042_s17  ;;  %p3048_p13 = scmp.lt.s32.totalorder %s3042_s17, %s3042_s17 }
  0x1e   :  { %p3049_p0 = por %p3048_p13, %p3047_p12 }
  0x20   :  { %p3050_p1 = pnand %p3049_p0, %p3043_p11 }
  0x22   :  { %3053 = shalt.err (!%p3050_p1)
}
  0x23   :  { %s3154_s2 = smov 64   ;;  %s3155_s14 = smov 4  }
  0x24   :  { %71 = dma.hbm_to_vmem [thread:$0]  %s3410_s6, 3072, %s66_s28, [#allocation10], %s3154_s2, %s3154_s2, %s3155_s14  }
  0x25   :  { %s3156_s20 = smov [#allocation3]   ;;  %s3157_s22 = smov [#allocation8]  }
  0x26   :  { %s28_s21 = sshll.u32 %s3156_s20, 4  ;;  %s51_s23 = sshll.u32 %s3157_s22, 4  ;;  %s29_s21 = int_to_ptr.vmem [resolvable:$true] %s28_s21  ;;  %s3247_s23 = int_to_ptr.vmem [resolvable:$true] %s51_s23 }
  0x27   :  { %s3054_s26 = scalar_lea.hbm %s3405_s1, 128 }
  0x28   :  { %p3055_p2 = scmp.ne.s32.totalorder %s3405_s1, %s3054_s26  ;;  %p3058_p3 = scmp.lt.u32.totalorder %s3054_s26, %s3405_s1 }
  0x2a   :  { %p3060_p4 = pnand %p3058_p3, %p3055_p2 }
  0x2c   :  { %3063 = shalt.err (!%p3060_p4)
}
  0x2d   :  { %s3064_s6 = scalar_lea.vmem %s29_s21, 128  ;;  %p3069_p6 = scmp.lt.s32.totalorder %s29_s21, %s29_s21 }
  0x2e   :  { %p3065_p5 = scmp.ne.s32.totalorder %s29_s21, %s3064_s6  ;;  %p3070_p7 = scmp.lt.s32.totalorder %s3064_s6, %s3064_s6 }
  0x30   :  { %p3071_p8 = por %p3070_p7, %p3069_p6 }
  0x32   :  { %p3072_p9 = pnand %p3071_p8, %p3065_p5 }
  0x34   :  { %3075 = shalt.err (!%p3072_p9)
}
  0x35   :  { %31 = dma.hbm_to_vmem [thread:$0]  %s3405_s1, 128, %s29_s21, [#allocation4]  }
  0x36   :  { %s3076_s16 = scalar_lea.hbm %s3408_s4, 24576 }
  0x37   :  { %p3077_p10 = scmp.ne.s32.totalorder %s3408_s4, %s3076_s16  ;;  %p3080_p11 = scmp.lt.u32.totalorder %s3076_s16, %s3408_s4 }
  0x39   :  { %p3082_p12 = pnand %p3080_p11, %p3077_p10 }
  0x3b   :  { %3085 = shalt.err (!%p3082_p12)
}
  0x3c   :  { %s3086_s22 = scalar_lea.vmem %s3247_s23, 24576  ;;  %p3091_p0 = scmp.lt.s32.totalorder %s3247_s23, %s3247_s23 }
  0x3d   :  { %p3087_p13 = scmp.ne.s32.totalorder %s3247_s23, %s3086_s22  ;;  %p3092_p1 = scmp.lt.s32.totalorder %s3086_s22, %s3086_s22 }
  0x3f   :  { %p3093_p2 = por %p3092_p1, %p3091_p0 }
  0x41   :  { %p3094_p3 = pnand %p3093_p2, %p3087_p13 }
  0x43   :  { %3097 = shalt.err (!%p3094_p3)
}
  0x44   :  { %s3158_s1 = smov 384   ;;  %s3159_s21 = smov 24  }
  0x45   :  { %57 = dma.hbm_to_vmem [thread:$0]  %s3408_s4, 24576, %s3247_s23, [#allocation7], %s3158_s1, %s3158_s1, %s3159_s21  }
  0x46   :  { %s3160_s26 = smov [#allocation11]   ;;  %s3098_s11 = scalar_lea.hbm %s3412_s8, 3072 }
  0x47   :  { %s79_s27 = sshll.u32 %s3160_s26, 4  ;;  %p3099_p4 = scmp.ne.s32.totalorder %s3412_s8, %s3098_s11  ;;  %s80_s27 = int_to_ptr.vmem [resolvable:$true] %s79_s27 }
  0x48   :  { %p3102_p5 = scmp.lt.u32.totalorder %s3098_s11, %s3412_s8 }
  0x4a   :  { %p3104_p6 = pnand %p3102_p5, %p3099_p4 }
  0x4c   :  { %3107 = shalt.err (!%p3104_p6)
}
  0x4d   :  { %s3108_s15 = scalar_lea.vmem %s80_s27, 3072  ;;  %p3113_p8 = scmp.lt.s32.totalorder %s80_s27, %s80_s27 }
  0x4e   :  { %p3109_p7 = scmp.ne.s32.totalorder %s80_s27, %s3108_s15  ;;  %p3114_p9 = scmp.lt.s32.totalorder %s3108_s15, %s3108_s15 }
  0x50   :  { %p3115_p10 = por %p3114_p9, %p3113_p8 }
  0x52   :  { %p3116_p11 = pnand %p3115_p10, %p3109_p7 }
  0x54   :  { %3119 = shalt.err (!%p3116_p11)
}
  0x55   :  { %85 = dma.hbm_to_vmem [thread:$0]  %s3412_s8, 3072, %s80_s27, [#allocation10], %s3154_s2, %s3154_s2, %s3155_s14  }
  0x56   :  { %3142 = dma.done.wait [#allocation4], 128  }
  0x57   :  { %3143 = vsyncadd [#allocation4], 4294967168 }
  0x58   :  { %3144 = dma.done.wait [#allocation7], 25088  }
  0x59   :  { %3145 = vsyncadd [#allocation7], 4294942208 }
  0x5a   :  { %3146 = dma.done.wait [#allocation10], 6144  }
  0x5b   :  { %3147 = vsyncadd [#allocation10], 4294961152  ;;  %v3161_v0 = vmov 0   ;;  %v2662_v1 = vld [vmem:[#allocation6 + $0x4] ss:$16 sps:$4 sm:$0xff]   ;;  %v105_v3 = vld [vmem:[#allocation3] sm:$0xff] }
  0x5c   :  { %189 = vmatprep.mubr.bf16.mxu0 %v3161_v0  ;;  %230 = vmatprep.mubr.bf16.mxu1 %v3161_v0  ;;  %v2664_v2 = vld [vmem:[#allocation6] ss:$16 sps:$4 sm:$0xff]   ;;  %v106_v4 = vpack.c.bf16 %v105_v3, %v105_v3  ;;  %v2665_v5 = vld [vmem:[#allocation6 + $0xc] ss:$16 sps:$4 sm:$0xff]   ;;  %v2667_v6 = vld [vmem:[#allocation6 + $0x8] ss:$16 sps:$4 sm:$0xff]  }
  0x5d   :  { %157 = vmatprep.subr.bf16.mxu0 %v2662_v1  ;;  %vm153_vm0 = vcmask 130048   ;;  %v2668_v7 = vld [vmem:[#allocation8] ss:$24 sps:$4 sm:$0xff]   ;;  %198 = vmatprep.subr.bf16.mxu1 %v2665_v5  ;;  %v2670_v8 = vld [vmem:[#allocation8 + $0x4] ss:$24 sps:$4 sm:$0xff]   ;;  %vm3163_vm1 = vmmov 0  }
  0x5e   :  { %158 = vmatpush1.bf16.msra.mxu0 %v2664_v2  ;;  %199 = vmatpush1.bf16.msra.mxu1 %v2667_v6  ;;  %v2671_v9 = vld [vmem:[#allocation8 + $0x8] ss:$24 sps:$4 sm:$0xff]   ;;  %v2673_v10 = vld [vmem:[#allocation8 + $0xc] ss:$24 sps:$4 sm:$0xff]   ;;  %v2679_v13 = vld [vmem:[#allocation8 + $0x3c] ss:$24 sps:$4 sm:$0xff]  }
  0x5f   :  { %1431 = vmatprep.subr.bf16.mxu0 %v2670_v8  ;;  %v2676_v11 = vld [vmem:[#allocation8 + $0x34] ss:$24 sps:$4 sm:$0xff]   ;;  %1513 = vmatprep.subr.bf16.mxu1 %v2673_v10  ;;  %v2674_v12 = vld [vmem:[#allocation8 + $0x30] ss:$24 sps:$4 sm:$0xff]   ;;  %v2682_v15 = vld [vmem:[#allocation8 + $0x64] ss:$24 sps:$4 sm:$0xff]  }
  0x60   :  { %v2677_v14 = vld [vmem:[#allocation8 + $0x38] ss:$24 sps:$4 sm:$0xff]   ;;  %v2685_v16 = vld [vmem:[#allocation8 + $0x6c] ss:$24 sps:$4 sm:$0xff]   ;;  %v2683_v19 = vld [vmem:[#allocation8 + $0x68] ss:$24 sps:$4 sm:$0xff]  }
  0x61   :  { %2283 = vmatmul.mubr.msk.bf16.vlgmr.msra.gmra.mrb[0].mxu0 %vm153_vm0, %v106_v4  ;;  %2284 = vmatmul.mubr.msk.bf16.vlgmr.msra.gmra.mrb[0].mxu1 %vm153_vm0, %v106_v4  ;;  %v2680_v17 = vld [vmem:[#allocation8 + $0x60] ss:$24 sps:$4 sm:$0xff]   ;;  %v2688_v18 = vld [vmem:[#allocation8 + $0x94] ss:$24 sps:$4 sm:$0xff]   ;;  %v2686_v21 = vld [vmem:[#allocation8 + $0x90] ss:$24 sps:$4 sm:$0xff]  }
  0x62   :  { %1432 = vmatpush1.bf16.msra.mxu0 %v2668_v7  ;;  %1514 = vmatpush1.bf16.msra.mxu1 %v2671_v9  ;;  %v2691_v20 = vld [vmem:[#allocation8 + $0x9c] ss:$24 sps:$4 sm:$0xff]   ;;  %v2689_v23 = vld [vmem:[#allocation8 + $0x98] ss:$24 sps:$4 sm:$0xff]   ;;  %v2697_v24 = vld [vmem:[#allocation8 + $0xcc] ss:$24 sps:$4 sm:$0xff]   ;;  %v113_v9 = vlaneseq }
  0x63   :  { %1433 = vmatprep.subr.bf16.mxu0 %v2676_v11  ;;  %1515 = vmatprep.subr.bf16.mxu1 %v2679_v13  ;;  %v2694_v22 = vld [vmem:[#allocation8 + $0xc4] ss:$24 sps:$4 sm:$0xff]   ;;  %v2692_v25 = vld [vmem:[#allocation8 + $0xc0] ss:$24 sps:$4 sm:$0xff]   ;;  %v2700_v26 = vld [vmem:[#allocation8 + $0xf4] ss:$24 sps:$4 sm:$0xff]  }
  0x64   :  { %v2695_v27 = vld [vmem:[#allocation8 + $0xc8] ss:$24 sps:$4 sm:$0xff]   ;;  %v2703_v28 = vld [vmem:[#allocation8 + $0xfc] ss:$24 sps:$4 sm:$0xff]   ;;  %v2701_v31 = vld [vmem:[#allocation8 + $0xf8] ss:$24 sps:$4 sm:$0xff]  }
  0x65   :  { %v2698_v29 = vld [vmem:[#allocation8 + $0xf0] ss:$24 sps:$4 sm:$0xff]   ;;  %v2706_v30 = vld [vmem:[#allocation8 + $0x124] ss:$24 sps:$4 sm:$0xff]   ;;  %v2704_v33 = vld [vmem:[#allocation8 + $0x120] ss:$24 sps:$4 sm:$0xff]  }
  0x66   :  { %1434 = vmatpush1.bf16.msra.mxu0 %v2674_v12  ;;  %1516 = vmatpush1.bf16.msra.mxu1 %v2677_v14  ;;  %v2709_v32 = vld [vmem:[#allocation8 + $0x12c] ss:$24 sps:$4 sm:$0xff]   ;;  %v2707_v35 = vld [vmem:[#allocation8 + $0x128] ss:$24 sps:$4 sm:$0xff]   ;;  %v2715_v36 = vld [vmem:[#allocation8 + $0x15c] ss:$24 sps:$4 sm:$0xff]  }
  0x67   :  { %1435 = vmatprep.subr.bf16.mxu0 %v2682_v15  ;;  %1517 = vmatprep.subr.bf16.mxu1 %v2685_v16  ;;  %v2712_v34 = vld [vmem:[#allocation8 + $0x154] ss:$24 sps:$4 sm:$0xff]   ;;  %v2710_v37 = vld [vmem:[#allocation8 + $0x150] ss:$24 sps:$4 sm:$0xff]   ;;  %v2718_v38 = vld [vmem:[#allocation8 + $0x184] ss:$24 sps:$4 sm:$0xff]  }
  0x68   :  { %v2713_v39 = vld [vmem:[#allocation8 + $0x158] ss:$24 sps:$4 sm:$0xff]   ;;  %v2721_v40 = vld [vmem:[#allocation8 + $0x18c] ss:$24 sps:$4 sm:$0xff]   ;;  %v2719_v43 = vld [vmem:[#allocation8 + $0x188] ss:$24 sps:$4 sm:$0xff]  }
  0x69   :  { %v2716_v41 = vld [vmem:[#allocation8 + $0x180] ss:$24 sps:$4 sm:$0xff]   ;;  %v2724_v42 = vld [vmem:[#allocation8 + $0x1b4] ss:$24 sps:$4 sm:$0xff]   ;;  %v2722_v44 = vld [vmem:[#allocation8 + $0x1b0] ss:$24 sps:$4 sm:$0xff]  }
  0x6a   :  { %1436 = vmatpush1.bf16.msra.mxu0 %v2680_v17  ;;  %1518 = vmatpush1.bf16.msra.mxu1 %v2683_v19  ;;  %v2727_v45 = vld [vmem:[#allocation8 + $0x1bc] ss:$24 sps:$4 sm:$0xff]   ;;  %v2725_v46 = vld [vmem:[#allocation8 + $0x1b8] ss:$24 sps:$4 sm:$0xff]   ;;  %v2733_v48 = vld [vmem:[#allocation8 + $0x1ec] ss:$24 sps:$4 sm:$0xff]  }
  0x6b   :  { %1437 = vmatprep.subr.bf16.mxu0 %v2688_v18  ;;  %1519 = vmatprep.subr.bf16.mxu1 %v2691_v20  ;;  %v2730_v47 = vld [vmem:[#allocation8 + $0x1e4] ss:$24 sps:$4 sm:$0xff]   ;;  %v2728_v49 = vld [vmem:[#allocation8 + $0x1e0] ss:$24 sps:$4 sm:$0xff]   ;;  %v2736_v50 = vld [vmem:[#allocation8 + $0x214] ss:$24 sps:$4 sm:$0xff]  }
  0x6c   :  { %v2731_v51 = vld [vmem:[#allocation8 + $0x1e8] ss:$24 sps:$4 sm:$0xff]   ;;  %v2739_v52 = vld [vmem:[#allocation8 + $0x21c] ss:$24 sps:$4 sm:$0xff]   ;;  %v2737_v55 = vld [vmem:[#allocation8 + $0x218] ss:$24 sps:$4 sm:$0xff]  }
  0x6d   :  { %v2734_v53 = vld [vmem:[#allocation8 + $0x210] ss:$24 sps:$4 sm:$0xff]   ;;  %v2742_v54 = vld [vmem:[#allocation8 + $0x244] ss:$24 sps:$4 sm:$0xff]   ;;  %v2740_v57 = vld [vmem:[#allocation8 + $0x240] ss:$24 sps:$4 sm:$0xff]  }
  0x6e   :  { %1438 = vmatpush1.bf16.msra.mxu0 %v2686_v21  ;;  %1520 = vmatpush1.bf16.msra.mxu1 %v2689_v23  ;;  %v2745_v56 = vld [vmem:[#allocation8 + $0x24c] ss:$24 sps:$4 sm:$0xff]   ;;  %v2743_v59 = vld [vmem:[#allocation8 + $0x248] ss:$24 sps:$4 sm:$0xff]   ;;  %v2751_v60 = vld [vmem:[#allocation8 + $0x27c] ss:$24 sps:$4 sm:$0xff]  }
  0x6f   :  { %1439 = vmatprep.subr.bf16.mxu0 %v2694_v22  ;;  %1521 = vmatprep.subr.bf16.mxu1 %v2697_v24  ;;  %v2748_v58 = vld [vmem:[#allocation8 + $0x274] ss:$24 sps:$4 sm:$0xff]   ;;  %v2746_v61 = vld [vmem:[#allocation8 + $0x270] ss:$24 sps:$4 sm:$0xff]   ;;  %v2754_v63 = vld [vmem:[#allocation8 + $0x2a4] ss:$24 sps:$4 sm:$0xff]  }
  0x70   :  { %v2749_v62 = vld [vmem:[#allocation8 + $0x278] ss:$24 sps:$4 sm:$0xff]   ;;  %v2757_v0 = vld [vmem:[#allocation8 + $0x2ac] ss:$24 sps:$4 sm:$0xff]   ;;  %v2755_v2 = vld [vmem:[#allocation8 + $0x2a8] ss:$24 sps:$4 sm:$0xff]  }
  0x71   :  { %v2752_v1 = vld [vmem:[#allocation8 + $0x2a0] ss:$24 sps:$4 sm:$0xff]   ;;  %v2760_v3 = vld [vmem:[#allocation8 + $0x2d4] ss:$24 sps:$4 sm:$0xff]   ;;  %v2758_v5 = vld [vmem:[#allocation8 + $0x2d0] ss:$24 sps:$4 sm:$0xff]  }
  0x72   :  { %1440 = vmatpush1.bf16.msra.mxu0 %v2692_v25  ;;  %1522 = vmatpush1.bf16.msra.mxu1 %v2695_v27  ;;  %v2763_v4 = vld [vmem:[#allocation8 + $0x2dc] ss:$24 sps:$4 sm:$0xff]   ;;  %v2761_v6 = vld [vmem:[#allocation8 + $0x2d8] ss:$24 sps:$4 sm:$0xff]   ;;  %v2769_v8 = vld [vmem:[#allocation8 + $0x30c] ss:$24 sps:$4 sm:$0xff]  }
  0x73   :  { %1441 = vmatprep.subr.bf16.mxu0 %v2700_v26  ;;  %1523 = vmatprep.subr.bf16.mxu1 %v2703_v28  ;;  %v2766_v7 = vld [vmem:[#allocation8 + $0x304] ss:$24 sps:$4 sm:$0xff]   ;;  %v3293_v10 = vshrl.u32 %v113_v9, 7  ;;  %v3299_v12 = vld [vmem:[%s3407_s3] sm:$0xf] }
  0x74   :  { %v2826_v9 = vld [vmem:[#allocation8 + $0x4e4] ss:$24 sps:$4 sm:$0xff]  }
  0x75   :  { %v115_v11 = vsub.s32 0, %v3293_v10  ;;  %v119_v13 = vsub.s32 1, %v3293_v10  ;;  %v127_v14 = vsub.s32 3, %v3293_v10 }
  0x76   :  { %1442 = vmatpush1.bf16.msra.mxu0 %v2698_v29  ;;  %1524 = vmatpush1.bf16.msra.mxu1 %v2701_v31 }
  0x77   :  { %1443 = vmatprep.subr.bf16.mxu0 %v2706_v30  ;;  %1525 = vmatprep.subr.bf16.mxu1 %v2709_v32  ;;  %v116_v15 = vrot.slane %v3299_v12, %v115_v11  ;;  %v120_v16 = vrot.slane %v3299_v12, %v119_v13  ;;  %v128_v18 = vrot.slane %v3299_v12, %v127_v14  ;;  %v2764_v32 = vld [vmem:[#allocation8 + $0x300] ss:$24 sps:$4 sm:$0xff]  }
  0x7a   :  { %1444 = vmatpush1.bf16.msra.mxu0 %v2704_v33  ;;  %1526 = vmatpush1.bf16.msra.mxu1 %v2707_v35  ;;  %v2767_v33 = vld [vmem:[#allocation8 + $0x308] ss:$24 sps:$4 sm:$0xff]  }
  0x7b   :  { %1445 = vmatprep.subr.bf16.mxu0 %v2712_v34  ;;  %1527 = vmatprep.subr.bf16.mxu1 %v2715_v36  ;;  %v2772_v36 = vld [vmem:[#allocation8 + $0x334] ss:$24 sps:$4 sm:$0xff]  }
  0x7e   :  { %1446 = vmatpush1.bf16.msra.mxu0 %v2710_v37  ;;  %1528 = vmatpush1.bf16.msra.mxu1 %v2713_v39  ;;  %v2775_v37 = vld [vmem:[#allocation8 + $0x33c] ss:$24 sps:$4 sm:$0xff]   ;;  %v2770_v39 = vld [vmem:[#allocation8 + $0x330] ss:$24 sps:$4 sm:$0xff]  }
  0x7f   :  { %1447 = vmatprep.subr.bf16.mxu0 %v2718_v38  ;;  %1529 = vmatprep.subr.bf16.mxu1 %v2721_v40  ;;  %v2773_v40 = vld [vmem:[#allocation8 + $0x338] ss:$24 sps:$4 sm:$0xff]  }
  0x82   :  { %1448 = vmatpush1.bf16.msra.mxu0 %v2716_v41  ;;  %1530 = vmatpush1.bf16.msra.mxu1 %v2719_v43  ;;  %v2778_v41 = vld [vmem:[#allocation8 + $0x364] ss:$24 sps:$4 sm:$0xff]   ;;  %v2776_v43 = vld [vmem:[#allocation8 + $0x360] ss:$24 sps:$4 sm:$0xff]  }
  0x83   :  { %1449 = vmatprep.subr.bf16.mxu0 %v2724_v42  ;;  %1531 = vmatprep.subr.bf16.mxu1 %v2727_v45  ;;  %v2781_v42 = vld [vmem:[#allocation8 + $0x36c] ss:$24 sps:$4 sm:$0xff]  }
  0x84   :  { %v2784_v45 = vld [vmem:[#allocation8 + $0x394] ss:$24 sps:$4 sm:$0xff]  }
  0x86   :  { %1450 = vmatpush1.bf16.msra.mxu0 %v2722_v44  ;;  %1532 = vmatpush1.bf16.msra.mxu1 %v2725_v46  ;;  %v2779_v44 = vld [vmem:[#allocation8 + $0x368] ss:$24 sps:$4 sm:$0xff]   ;;  %v2787_v46 = vld [vmem:[#allocation8 + $0x39c] ss:$24 sps:$4 sm:$0xff]  }
  0x87   :  { %1451 = vmatprep.subr.bf16.mxu0 %v2730_v47  ;;  %1533 = vmatprep.subr.bf16.mxu1 %v2733_v48  ;;  %v2782_v47 = vld [vmem:[#allocation8 + $0x390] ss:$24 sps:$4 sm:$0xff]  }
  0x88   :  { %v2785_v48 = vld [vmem:[#allocation8 + $0x398] ss:$24 sps:$4 sm:$0xff]  }
  0x8a   :  { %1452 = vmatpush1.bf16.msra.mxu0 %v2728_v49  ;;  %1534 = vmatpush1.bf16.msra.mxu1 %v2731_v51  ;;  %v2790_v49 = vld [vmem:[#allocation8 + $0x3c4] ss:$24 sps:$4 sm:$0xff]   ;;  %v2788_v51 = vld [vmem:[#allocation8 + $0x3c0] ss:$24 sps:$4 sm:$0xff]  }
  0x8b   :  { %1453 = vmatprep.subr.bf16.mxu0 %v2736_v50  ;;  %1535 = vmatprep.subr.bf16.mxu1 %v2739_v52  ;;  %v2793_v50 = vld [vmem:[#allocation8 + $0x3cc] ss:$24 sps:$4 sm:$0xff]   ;;  %v2791_v52 = vld [vmem:[#allocation8 + $0x3c8] ss:$24 sps:$4 sm:$0xff]  }
  0x8e   :  { %1454 = vmatpush1.bf16.msra.mxu0 %v2734_v53  ;;  %1536 = vmatpush1.bf16.msra.mxu1 %v2737_v55  ;;  %v2796_v53 = vld [vmem:[#allocation8 + $0x3f4] ss:$24 sps:$4 sm:$0xff]   ;;  %v2794_v55 = vld [vmem:[#allocation8 + $0x3f0] ss:$24 sps:$4 sm:$0xff]  }
  0x8f   :  { %1455 = vmatprep.subr.bf16.mxu0 %v2742_v54  ;;  %1537 = vmatprep.subr.bf16.mxu1 %v2745_v56  ;;  %v2799_v54 = vld [vmem:[#allocation8 + $0x3fc] ss:$24 sps:$4 sm:$0xff]   ;;  %v2797_v56 = vld [vmem:[#allocation8 + $0x3f8] ss:$24 sps:$4 sm:$0xff]  }
  0x92   :  { %1456 = vmatpush1.bf16.msra.mxu0 %v2740_v57  ;;  %1538 = vmatpush1.bf16.msra.mxu1 %v2743_v59  ;;  %v2802_v57 = vld [vmem:[#allocation8 + $0x424] ss:$24 sps:$4 sm:$0xff]   ;;  %v2800_v59 = vld [vmem:[#allocation8 + $0x420] ss:$24 sps:$4 sm:$0xff]  }
  0x93   :  { %1457 = vmatprep.subr.bf16.mxu0 %v2748_v58  ;;  %1539 = vmatprep.subr.bf16.mxu1 %v2751_v60  ;;  %v2805_v58 = vld [vmem:[#allocation8 + $0x42c] ss:$24 sps:$4 sm:$0xff]   ;;  %v2803_v60 = vld [vmem:[#allocation8 + $0x428] ss:$24 sps:$4 sm:$0xff]  }
  0x96   :  { %1458 = vmatpush1.bf16.msra.mxu0 %v2746_v61  ;;  %1540 = vmatpush1.bf16.msra.mxu1 %v2749_v62  ;;  %v2808_v61 = vld [vmem:[#allocation8 + $0x454] ss:$24 sps:$4 sm:$0xff]  }
  0x97   :  { %1459 = vmatprep.subr.bf16.mxu0 %v2754_v63  ;;  %1541 = vmatprep.subr.bf16.mxu1 %v2757_v0  ;;  %v2811_v62 = vld [vmem:[#allocation8 + $0x45c] ss:$24 sps:$4 sm:$0xff]   ;;  %v2806_v63 = vld [vmem:[#allocation8 + $0x450] ss:$24 sps:$4 sm:$0xff]  }
  0x98   :  { %v2809_v0 = vld [vmem:[#allocation8 + $0x458] ss:$24 sps:$4 sm:$0xff]  }
  0x9a   :  { %1460 = vmatpush1.bf16.msra.mxu0 %v2752_v1  ;;  %1542 = vmatpush1.bf16.msra.mxu1 %v2755_v2  ;;  %v2814_v1 = vld [vmem:[#allocation8 + $0x484] ss:$24 sps:$4 sm:$0xff]  }
  0x9b   :  { %1461 = vmatprep.subr.bf16.mxu0 %v2760_v3  ;;  %1543 = vmatprep.subr.bf16.mxu1 %v2763_v4  ;;  %v2817_v2 = vld [vmem:[#allocation8 + $0x48c] ss:$24 sps:$4 sm:$0xff]   ;;  %v2812_v3 = vld [vmem:[#allocation8 + $0x480] ss:$24 sps:$4 sm:$0xff]  }
  0x9c   :  { %v2815_v4 = vld [vmem:[#allocation8 + $0x488] ss:$24 sps:$4 sm:$0xff]  }
  0x9e   :  { %1462 = vmatpush1.bf16.msra.mxu0 %v2758_v5  ;;  %1544 = vmatpush1.bf16.msra.mxu1 %v2761_v6  ;;  %v2820_v5 = vld [vmem:[#allocation8 + $0x4b4] ss:$24 sps:$4 sm:$0xff]  }
  0x9f   :  { %1472 = vmatprep.subr.bf16.mxu0 %v2766_v7  ;;  %1554 = vmatprep.subr.bf16.mxu1 %v2769_v8  ;;  %v2823_v6 = vld [vmem:[#allocation8 + $0x4bc] ss:$24 sps:$4 sm:$0xff]   ;;  %v2818_v7 = vld [vmem:[#allocation8 + $0x4b0] ss:$24 sps:$4 sm:$0xff]  }
  0xa0   :  { %v2821_v8 = vld [vmem:[#allocation8 + $0x4b8] ss:$24 sps:$4 sm:$0xff]  }
 0x134   :  { %v191_v17 = vpop.f32.mrb[0].mxu0  ;;  %v3312_v23 = vpop.f32.mrb[0].mxu1 }
 0x135   :  { %v192_v19 = vadd.f32 %v191_v17, %v116_v15  ;;  %v193_v20 = vpop.f32.mrb[1].mxu0  ;;  %v234_v26 = vpop.f32.mrb[1].mxu1  ;;  %v2829_v15 = vld [vmem:[#allocation8 + $0x4ec] ss:$24 sps:$4 sm:$0xff]   ;;  %v2827_v17 = vld [vmem:[#allocation8 + $0x4e8] ss:$24 sps:$4 sm:$0xff]  }
 0x136   :  { %v194_v21 = vadd.f32 %v193_v20, %v120_v16  ;;  %v195_v22 = vpop.f32.mrb[2].mxu0  ;;  %v235_v28 = vadd.f32 %v234_v26, %v128_v18  ;;  %v236_v29 = vpop.f32.mrb[2].mxu1  ;;  %v2824_v16 = vld [vmem:[#allocation8 + $0x4e0] ss:$24 sps:$4 sm:$0xff]   ;;  %v2832_v18 = vld [vmem:[#allocation8 + $0x514] ss:$24 sps:$4 sm:$0xff]  }
 0x137   :  { %v239_v24 = vmax.f32 %v192_v19, 0.0  ;;  %v196_v25 = vpop.f32.mrb[3].mxu0  ;;  %v237_v30 = vpop.f32.mrb[3].mxu1  ;;  %v2835_v19 = vld [vmem:[#allocation8 + $0x51c] ss:$24 sps:$4 sm:$0xff]  }
 0x138   :  { %v240_v27 = vmax.f32 %v194_v21, 0.0  ;;  %v242_v34 = vmax.f32 %v235_v28, 0.0  ;;  %v2830_v20 = vld [vmem:[#allocation8 + $0x510] ss:$24 sps:$4 sm:$0xff]   ;;  %v2838_v22 = vld [vmem:[#allocation8 + $0x544] ss:$24 sps:$4 sm:$0xff]  }
 0x139   :  { %v3316_v35 = vpack.c.bf16 %v239_v24, %v239_v24  ;;  %v2833_v21 = vld [vmem:[#allocation8 + $0x518] ss:$24 sps:$4 sm:$0xff]   ;;  %v2841_v24 = vld [vmem:[#allocation8 + $0x54c] ss:$24 sps:$4 sm:$0xff]   ;;  %v123_v25 = vsub.s32 2, %v3293_v10 }
 0x13a   :  { %v3314_v31 = vpack.c.bf16 %v240_v27, %v240_v27  ;;  %v3320_v38 = vpack.c.bf16 %v242_v34, %v242_v34  ;;  %v2836_v26 = vld [vmem:[#allocation8 + $0x540] ss:$24 sps:$4 sm:$0xff]   ;;  %v2844_v28 = vld [vmem:[#allocation8 + $0x574] ss:$24 sps:$4 sm:$0xff]   ;;  %v2850_v34 = vld [vmem:[#allocation8 + $0x5a4] ss:$24 sps:$4 sm:$0xff]  }
 0x13b   :  { %v2839_v27 = vld [vmem:[#allocation8 + $0x548] ss:$24 sps:$4 sm:$0xff]   ;;  %v2847_v29 = vld [vmem:[#allocation8 + $0x57c] ss:$24 sps:$4 sm:$0xff]   ;;  %v124_v30 = vrot.slane %v3299_v12, %v123_v25 }
 0x13c   :  { %1463 = vmatprep.mubr.bf16.mxu0 %v3314_v31  ;;  %1545 = vmatprep.mubr.bf16.mxu1 %v3314_v31  ;;  %v2854_v12 = vld [vmem:[#allocation8 + $0x5d0] ss:$24 sps:$4 sm:$0xff]  }
 0x13d   :  { %1464 = vmatmul.mubr.bf16.vlgmr.msra.gmra.mrb[4].mxu0 %v3316_v35  ;;  %1546 = vmatmul.mubr.bf16.vlgmr.msra.gmra.mrb[4].mxu1 %v3316_v35 }
 0x13e   :  { %1473 = vmatpush1.bf16.msra.mxu0 %v2764_v32  ;;  %1555 = vmatpush1.bf16.msra.mxu1 %v2767_v33  ;;  %v2842_v32 = vld [vmem:[#allocation8 + $0x570] ss:$24 sps:$4 sm:$0xff]  }
 0x13f   :  { %1474 = vmatprep.subr.bf16.mxu0 %v2772_v36  ;;  %1556 = vmatprep.subr.bf16.mxu1 %v2775_v37  ;;  %v2845_v33 = vld [vmem:[#allocation8 + $0x578] ss:$24 sps:$4 sm:$0xff]   ;;  %v2853_v36 = vld [vmem:[#allocation8 + $0x5ac] ss:$24 sps:$4 sm:$0xff]   ;;  %v233_v37 = vadd.f32 %v3312_v23, %v124_v30 }
 0x140   :  { %1504 = vmatprep.mubr.bf16.mxu0 %v3320_v38  ;;  %1586 = vmatprep.mubr.bf16.mxu1 %v3320_v38  ;;  %v2860_v23 = vld [vmem:[#allocation8 + $0x10] ss:$24 sps:$4 sm:$0xff]   ;;  %v2905_v30 = vld [vmem:[#allocation8 + $0x2e0] ss:$24 sps:$4 sm:$0xff]  }
 0x142   :  { %1475 = vmatpush1.bf16.msra.mxu0 %v2770_v39  ;;  %1557 = vmatpush1.bf16.msra.mxu1 %v2773_v40  ;;  %v2848_v39 = vld [vmem:[#allocation8 + $0x5a0] ss:$24 sps:$4 sm:$0xff]  }
 0x143   :  { %1476 = vmatprep.subr.bf16.mxu0 %v2778_v41  ;;  %1558 = vmatprep.subr.bf16.mxu1 %v2781_v42  ;;  %v2851_v40 = vld [vmem:[#allocation8 + $0x5a8] ss:$24 sps:$4 sm:$0xff]   ;;  %v2856_v41 = vld [vmem:[#allocation8 + $0x5d4] ss:$24 sps:$4 sm:$0xff]  }
 0x144   :  { %v2859_v42 = vld [vmem:[#allocation8 + $0x5dc] ss:$24 sps:$4 sm:$0xff]  }
 0x146   :  { %1477 = vmatpush1.bf16.msra.mxu0 %v2776_v43  ;;  %1559 = vmatpush1.bf16.msra.mxu1 %v2779_v44  ;;  %v241_v43 = vmax.f32 %v233_v37, 0.0  ;;  %v2857_v44 = vld [vmem:[#allocation8 + $0x5d8] ss:$24 sps:$4 sm:$0xff]   ;;  %v2916_v37 = vld [vmem:[#allocation8 + $0x374] ss:$24 sps:$4 sm:$0xff]  }
 0x147   :  { %1478 = vmatprep.subr.bf16.mxu0 %v2784_v45  ;;  %1560 = vmatprep.subr.bf16.mxu1 %v2787_v46  ;;  %v2862_v45 = vld [vmem:[#allocation8 + $0x14] ss:$24 sps:$4 sm:$0xff]  }
 0x148   :  { %v3331_v46 = vpack.c.bf16 %v241_v43, %v241_v43  ;;  %v2920_v43 = vld [vmem:[#allocation8 + $0x3d0] ss:$24 sps:$4 sm:$0xff]  }
 0x14a   :  { %1479 = vmatpush1.bf16.msra.mxu0 %v2782_v47  ;;  %1561 = vmatpush1.bf16.msra.mxu1 %v2785_v48  ;;  %v2865_v47 = vld [vmem:[#allocation8 + $0x44] ss:$24 sps:$4 sm:$0xff]  }
 0x14b   :  { %1480 = vmatprep.subr.bf16.mxu0 %v2790_v49  ;;  %1562 = vmatprep.subr.bf16.mxu1 %v2793_v50  ;;  %v2956_v48 = vld [vmem:[#allocation9 + $0x40] sm:$0xff]   ;;  %v2958_v50 = vld [vmem:[#allocation9 + $0x48] sm:$0xff]  }
 0x14c   :  { %v2957_v49 = vld [vmem:[#allocation9] sm:$0xff]  }
 0x14e   :  { %1481 = vmatpush1.bf16.msra.mxu0 %v2788_v51  ;;  %1563 = vmatpush1.bf16.msra.mxu1 %v2791_v52  ;;  %v2863_v51 = vld [vmem:[#allocation8 + $0x40] ss:$24 sps:$4 sm:$0xff]   ;;  %v2868_v52 = vld [vmem:[#allocation8 + $0x74] ss:$24 sps:$4 sm:$0xff]  }
 0x14f   :  { %1482 = vmatprep.subr.bf16.mxu0 %v2796_v53  ;;  %1564 = vmatprep.subr.bf16.mxu1 %v2799_v54  ;;  %v2959_v53 = vld [vmem:[#allocation9 + $0x8] sm:$0xff]   ;;  %v2960_v54 = vld [vmem:[#allocation9 + $0x50] sm:$0xff]  }
 0x152   :  { %1483 = vmatpush1.bf16.msra.mxu0 %v2794_v55  ;;  %1565 = vmatpush1.bf16.msra.mxu1 %v2797_v56  ;;  %v2866_v55 = vld [vmem:[#allocation8 + $0x70] ss:$24 sps:$4 sm:$0xff]   ;;  %v2871_v56 = vld [vmem:[#allocation8 + $0xa4] ss:$24 sps:$4 sm:$0xff]  }
 0x153   :  { %1484 = vmatprep.subr.bf16.mxu0 %v2802_v57  ;;  %1566 = vmatprep.subr.bf16.mxu1 %v2805_v58  ;;  %v2961_v57 = vld [vmem:[#allocation9 + $0x10] sm:$0xff]   ;;  %v2962_v58 = vld [vmem:[#allocation9 + $0x58] sm:$0xff]  }
 0x156   :  { %1485 = vmatpush1.bf16.msra.mxu0 %v2800_v59  ;;  %1567 = vmatpush1.bf16.msra.mxu1 %v2803_v60  ;;  %v2869_v59 = vld [vmem:[#allocation8 + $0xa0] ss:$24 sps:$4 sm:$0xff]  }
 0x157   :  { %1486 = vmatprep.subr.bf16.mxu0 %v2808_v61  ;;  %1568 = vmatprep.subr.bf16.mxu1 %v2811_v62  ;;  %v2963_v60 = vld [vmem:[#allocation9 + $0x18] sm:$0xff]   ;;  %v2964_v61 = vld [vmem:[#allocation9 + $0x60] sm:$0xff]   ;;  %v2872_v62 = vld [vmem:[#allocation8 + $0xd0] ss:$24 sps:$4 sm:$0xff]  }
 0x15a   :  { %1487 = vmatpush1.bf16.msra.mxu0 %v2806_v63  ;;  %1569 = vmatpush1.bf16.msra.mxu1 %v2809_v0  ;;  %v2877_v63 = vld [vmem:[#allocation8 + $0x104] ss:$24 sps:$4 sm:$0xff]  }
 0x15b   :  { %1488 = vmatprep.subr.bf16.mxu0 %v2814_v1  ;;  %1570 = vmatprep.subr.bf16.mxu1 %v2817_v2  ;;  %v2965_v0 = vld [vmem:[#allocation9 + $0x20] sm:$0xff]   ;;  %v2966_v1 = vld [vmem:[#allocation9 + $0x68] sm:$0xff]  }
 0x15c   :  { %v2875_v2 = vld [vmem:[#allocation8 + $0x100] ss:$24 sps:$4 sm:$0xff]  }
 0x15e   :  { %1489 = vmatpush1.bf16.msra.mxu0 %v2812_v3  ;;  %1571 = vmatpush1.bf16.msra.mxu1 %v2815_v4  ;;  %v2880_v3 = vld [vmem:[#allocation8 + $0x134] ss:$24 sps:$4 sm:$0xff]  }
 0x15f   :  { %1490 = vmatprep.subr.bf16.mxu0 %v2820_v5  ;;  %1572 = vmatprep.subr.bf16.mxu1 %v2823_v6  ;;  %v2967_v4 = vld [vmem:[#allocation9 + $0x28] sm:$0xff]   ;;  %v2883_v6 = vld [vmem:[#allocation8 + $0x164] ss:$24 sps:$4 sm:$0xff]  }
 0x160   :  { %v2878_v5 = vld [vmem:[#allocation8 + $0x130] ss:$24 sps:$4 sm:$0xff]  }
 0x162   :  { %1491 = vmatpush1.bf16.msra.mxu0 %v2818_v7  ;;  %1573 = vmatpush1.bf16.msra.mxu1 %v2821_v8  ;;  %v2881_v7 = vld [vmem:[#allocation8 + $0x160] ss:$24 sps:$4 sm:$0xff]   ;;  %v2886_v8 = vld [vmem:[#allocation8 + $0x194] ss:$24 sps:$4 sm:$0xff]  }
 0x163   :  { %1492 = vmatprep.subr.bf16.mxu0 %v2826_v9  ;;  %1574 = vmatprep.subr.bf16.mxu1 %v2829_v15  ;;  %v2884_v9 = vld [vmem:[#allocation8 + $0x190] ss:$24 sps:$4 sm:$0xff]   ;;  %v2889_v15 = vld [vmem:[#allocation8 + $0x1c4] ss:$24 sps:$4 sm:$0xff]  }
 0x166   :  { %1493 = vmatpush1.bf16.msra.mxu0 %v2824_v16  ;;  %1575 = vmatpush1.bf16.msra.mxu1 %v2827_v17  ;;  %v2887_v16 = vld [vmem:[#allocation8 + $0x1c0] ss:$24 sps:$4 sm:$0xff]   ;;  %v2892_v17 = vld [vmem:[#allocation8 + $0x1f4] ss:$24 sps:$4 sm:$0xff]  }
 0x167   :  { %1494 = vmatprep.subr.bf16.mxu0 %v2832_v18  ;;  %1576 = vmatprep.subr.bf16.mxu1 %v2835_v19  ;;  %v2890_v18 = vld [vmem:[#allocation8 + $0x1f0] ss:$24 sps:$4 sm:$0xff]   ;;  %v2895_v19 = vld [vmem:[#allocation8 + $0x224] ss:$24 sps:$4 sm:$0xff]  }
 0x16a   :  { %1495 = vmatpush1.bf16.msra.mxu0 %v2830_v20  ;;  %1577 = vmatpush1.bf16.msra.mxu1 %v2833_v21  ;;  %v2893_v20 = vld [vmem:[#allocation8 + $0x220] ss:$24 sps:$4 sm:$0xff]   ;;  %v2898_v21 = vld [vmem:[#allocation8 + $0x254] ss:$24 sps:$4 sm:$0xff]  }
 0x16b   :  { %1496 = vmatprep.subr.bf16.mxu0 %v2838_v22  ;;  %1578 = vmatprep.subr.bf16.mxu1 %v2841_v24  ;;  %v2896_v22 = vld [vmem:[#allocation8 + $0x250] ss:$24 sps:$4 sm:$0xff]   ;;  %v2901_v24 = vld [vmem:[#allocation8 + $0x284] ss:$24 sps:$4 sm:$0xff]  }
 0x16e   :  { %1497 = vmatpush1.bf16.msra.mxu0 %v2836_v26  ;;  %1579 = vmatpush1.bf16.msra.mxu1 %v2839_v27  ;;  %v2899_v26 = vld [vmem:[#allocation8 + $0x280] ss:$24 sps:$4 sm:$0xff]   ;;  %v2904_v27 = vld [vmem:[#allocation8 + $0x2b4] ss:$24 sps:$4 sm:$0xff]  }
 0x16f   :  { %1498 = vmatprep.subr.bf16.mxu0 %v2844_v28  ;;  %1580 = vmatprep.subr.bf16.mxu1 %v2847_v29  ;;  %v2902_v28 = vld [vmem:[#allocation8 + $0x2b0] ss:$24 sps:$4 sm:$0xff]   ;;  %v2907_v29 = vld [vmem:[#allocation8 + $0x2e4] ss:$24 sps:$4 sm:$0xff]  }
 0x172   :  { %1499 = vmatpush1.bf16.msra.mxu0 %v2842_v32  ;;  %1581 = vmatpush1.bf16.msra.mxu1 %v2845_v33  ;;  %v2910_v32 = vld [vmem:[#allocation8 + $0x314] ss:$24 sps:$4 sm:$0xff]   ;;  %v2908_v33 = vld [vmem:[#allocation8 + $0x310] ss:$24 sps:$4 sm:$0xff]  }
 0x173   :  { %1500 = vmatprep.subr.bf16.mxu0 %v2850_v34  ;;  %1582 = vmatprep.subr.bf16.mxu1 %v2853_v36  ;;  %v2913_v34 = vld [vmem:[#allocation8 + $0x344] ss:$24 sps:$4 sm:$0xff]   ;;  %v2911_v36 = vld [vmem:[#allocation8 + $0x340] ss:$24 sps:$4 sm:$0xff]  }
 0x176   :  { %1501 = vmatpush1.bf16.msra.mxu0 %v2848_v39  ;;  %1583 = vmatpush1.bf16.msra.mxu1 %v2851_v40  ;;  %v2914_v39 = vld [vmem:[#allocation8 + $0x370] ss:$24 sps:$4 sm:$0xff]   ;;  %v2919_v40 = vld [vmem:[#allocation8 + $0x3a4] ss:$24 sps:$4 sm:$0xff]  }
 0x177   :  { %1502 = vmatprep.subr.bf16.mxu0 %v2856_v41  ;;  %1584 = vmatprep.subr.bf16.mxu1 %v2859_v42  ;;  %v2917_v41 = vld [vmem:[#allocation8 + $0x3a0] ss:$24 sps:$4 sm:$0xff]   ;;  %v2922_v42 = vld [vmem:[#allocation8 + $0x3d4] ss:$24 sps:$4 sm:$0xff]  }
 0x17a   :  { %1503 = vmatpush1.bf16.msra.mxu0 %v2854_v12  ;;  %1585 = vmatpush1.bf16.msra.mxu1 %v2857_v44  ;;  %v2925_v12 = vld [vmem:[#allocation8 + $0x404] ss:$24 sps:$4 sm:$0xff]   ;;  %v2968_v44 = vld [vmem:[#allocation9 + $0x70] sm:$0xff]  }
 0x17b   :  { %1595 = vmatprep.subr.bf16.mxu0 %v2862_v45  ;;  %2527 = vmatprep.subr.bf16.mxu1 %v2956_v48  ;;  %v2969_v45 = vld [vmem:[#allocation9 + $0x30] sm:$0xff]   ;;  %v2931_v48 = vld [vmem:[#allocation8 + $0x464] ss:$24 sps:$4 sm:$0xff]  }
 0x17d   :  { %1505 = vmatmul.mubr.bf16.vlgmr.msra.gmra.mrb[4].mxu0 %v3331_v46  ;;  %1587 = vmatmul.mubr.bf16.vlgmr.msra.gmra.mrb[4].mxu1 %v3331_v46 }
 0x17e   :  { %1596 = vmatpush1.bf16.msra.mxu0 %v2860_v23  ;;  %1627 = vmatprep.mubr.bf16.mxu0 %v3314_v31  ;;  %v2874_v31 = vld [vmem:[#allocation8 + $0xd4] ss:$24 sps:$4 sm:$0xff]   ;;  %v2926_v23 = vld [vmem:[#allocation8 + $0x430] ss:$24 sps:$4 sm:$0xff]  }
 0x17f   :  { %1597 = vmatprep.subr.bf16.mxu0 %v2865_v47  ;;  %2528 = vmatpush3.bf16.msra.mxu1 %v2957_v49  ;;  %v2970_v47 = vld [vmem:[#allocation9 + $0x78] sm:$0xff]  }
 0x180   :  { %2529 = vmatprep.subr.bf16.mxu1 %v2958_v50  ;;  %v2971_v49 = vld [vmem:[#allocation9 + $0x38] sm:$0xff]  }
 0x181   :  { %v2929_v50 = vld [vmem:[#allocation8 + $0x460] ss:$24 sps:$4 sm:$0xff]  }
 0x182   :  { %1598 = vmatpush1.bf16.msra.mxu0 %v2863_v51  ;;  %v2934_v51 = vld [vmem:[#allocation8 + $0x494] ss:$24 sps:$4 sm:$0xff]  }
 0x183   :  { %1599 = vmatprep.subr.bf16.mxu0 %v2868_v52  ;;  %2530 = vmatpush3.bf16.msra.mxu1 %v2959_v53  ;;  %v3162_v52 = vmov 0.0   ;;  %v2932_v53 = vld [vmem:[#allocation8 + $0x490] ss:$24 sps:$4 sm:$0xff]  }
 0x184   :  { %2531 = vmatprep.subr.bf16.mxu1 %v2960_v54  ;;  %v2937_v54 = vld [vmem:[#allocation8 + $0x4c4] ss:$24 sps:$4 sm:$0xff]  }
 0x186   :  { %1600 = vmatpush1.bf16.msra.mxu0 %v2866_v55  ;;  %v2935_v55 = vld [vmem:[#allocation8 + $0x4c0] ss:$24 sps:$4 sm:$0xff]  }
 0x187   :  { %1601 = vmatprep.subr.bf16.mxu0 %v2871_v56  ;;  %2532 = vmatpush3.bf16.msra.mxu1 %v2961_v57  ;;  %v2940_v56 = vld [vmem:[#allocation8 + $0x4f4] ss:$24 sps:$4 sm:$0xff]   ;;  %v2938_v57 = vld [vmem:[#allocation8 + $0x4f0] ss:$24 sps:$4 sm:$0xff]  }
 0x188   :  { %2533 = vmatprep.subr.bf16.mxu1 %v2962_v58  ;;  %v2943_v58 = vld [vmem:[#allocation8 + $0x524] ss:$24 sps:$4 sm:$0xff]  }
 0x18a   :  { %1602 = vmatpush1.bf16.msra.mxu0 %v2869_v59  ;;  %v2941_v59 = vld [vmem:[#allocation8 + $0x520] ss:$24 sps:$4 sm:$0xff]  }
 0x18b   :  { %1603 = vmatprep.subr.bf16.mxu0 %v2874_v31  ;;  %2534 = vmatpush3.bf16.msra.mxu1 %v2963_v60  ;;  %v2946_v31 = vld [vmem:[#allocation8 + $0x554] ss:$24 sps:$4 sm:$0xff]   ;;  %v2944_v60 = vld [vmem:[#allocation8 + $0x550] ss:$24 sps:$4 sm:$0xff]  }
 0x18c   :  { %2535 = vmatprep.subr.bf16.mxu1 %v2964_v61  ;;  %v2949_v61 = vld [vmem:[#allocation8 + $0x584] ss:$24 sps:$4 sm:$0xff]  }
 0x18e   :  { %1604 = vmatpush1.bf16.msra.mxu0 %v2872_v62  ;;  %v2947_v62 = vld [vmem:[#allocation8 + $0x580] ss:$24 sps:$4 sm:$0xff]  }
 0x18f   :  { %1605 = vmatprep.subr.bf16.mxu0 %v2877_v63  ;;  %2536 = vmatpush3.bf16.msra.mxu1 %v2965_v0  ;;  %v2952_v63 = vld [vmem:[#allocation8 + $0x5b4] ss:$24 sps:$4 sm:$0xff]   ;;  %v2950_v0 = vld [vmem:[#allocation8 + $0x5b0] ss:$24 sps:$4 sm:$0xff]  }
 0x190   :  { %2537 = vmatprep.subr.bf16.mxu1 %v2966_v1  ;;  %v2955_v1 = vld [vmem:[#allocation8 + $0x5e4] ss:$24 sps:$4 sm:$0xff]  }
 0x192   :  { %1606 = vmatpush1.bf16.msra.mxu0 %v2875_v2  ;;  %v2953_v2 = vld [vmem:[#allocation8 + $0x5e0] ss:$24 sps:$4 sm:$0xff]  }
 0x193   :  { %1607 = vmatprep.subr.bf16.mxu0 %v2880_v3  ;;  %2538 = vmatpush3.bf16.msra.mxu1 %v2967_v4  ;;  %v3343_v3 = vld [vmem:[%s3409_s5] sm:$0x3f] }
 0x194   :  { %2539 = vmatprep.subr.bf16.mxu1 %v2968_v44  ;;  %v444_v4 = vrot.slane %v3343_v3, %v115_v11  ;;  %v2988_v44 = vld [vmem:[#allocation11 + $0x60] sm:$0xff]  }
 0x196   :  { %1608 = vmatpush1.bf16.msra.mxu0 %v2878_v5  ;;  %v448_v5 = vrot.slane %v3343_v3, %v119_v13  ;;  %v2973_v13 = vld [vmem:[#allocation9 + $0x88] sm:$0xff]  }
 0x197   :  { %1609 = vmatprep.subr.bf16.mxu0 %v2883_v6  ;;  %2540 = vmatpush3.bf16.msra.mxu1 %v2969_v45  ;;  %v2990_v45 = vld [vmem:[#allocation11 + $0x68] sm:$0xff]  }
 0x198   :  { %2541 = vmatprep.subr.bf16.mxu1 %v2970_v47  ;;  %v2992_v47 = vld [vmem:[#allocation11 + $0x70] sm:$0xff]  }
 0x19a   :  { %1610 = vmatpush1.bf16.msra.mxu0 %v2881_v7 }
 0x19b   :  { %1611 = vmatprep.subr.bf16.mxu0 %v2886_v8  ;;  %2542 = vmatpush3.bf16.msra.mxu1 %v2971_v49  ;;  %v2994_v49 = vld [vmem:[#allocation11 + $0x78] sm:$0xff]  }
 0x19c   :  { %2589 = vmatprep.subr.bf16.mxu1 %v3162_v52 }
 0x19e   :  { %1612 = vmatpush1.bf16.msra.mxu0 %v2884_v9 }
 0x19f   :  { %1613 = vmatprep.subr.bf16.mxu0 %v2889_v15 }
 0x1a2   :  { %1614 = vmatpush1.bf16.msra.mxu0 %v2887_v16 }
 0x1a3   :  { %1615 = vmatprep.subr.bf16.mxu0 %v2892_v17 }
 0x1a6   :  { %1616 = vmatpush1.bf16.msra.mxu0 %v2890_v18 }
 0x1a7   :  { %1617 = vmatprep.subr.bf16.mxu0 %v2895_v19 }
 0x1aa   :  { %1618 = vmatpush1.bf16.msra.mxu0 %v2893_v20 }
 0x1ab   :  { %1619 = vmatprep.subr.bf16.mxu0 %v2898_v21 }
 0x1ae   :  { %1620 = vmatpush1.bf16.msra.mxu0 %v2896_v22 }
 0x1af   :  { %1621 = vmatprep.subr.bf16.mxu0 %v2901_v24  ;;  %v2972_v24 = vld [vmem:[#allocation9 + $0x80] sm:$0xff]  }
 0x1b2   :  { %1622 = vmatpush1.bf16.msra.mxu0 %v2899_v26  ;;  %v2974_v26 = vld [vmem:[#allocation9 + $0x90] sm:$0xff]  }
 0x1b3   :  { %1623 = vmatprep.subr.bf16.mxu0 %v2904_v27  ;;  %v2975_v27 = vld [vmem:[#allocation9 + $0x98] sm:$0xff]  }
 0x1b6   :  { %1624 = vmatpush1.bf16.msra.mxu0 %v2902_v28  ;;  %v2976_v28 = vld [vmem:[#allocation9 + $0xa0] sm:$0xff]  }
 0x1b7   :  { %1625 = vmatprep.subr.bf16.mxu0 %v2907_v29  ;;  %v2977_v29 = vld [vmem:[#allocation9 + $0xa8] sm:$0xff]  }
 0x1ba   :  { %1626 = vmatpush1.bf16.msra.mxu0 %v2905_v30  ;;  %v452_v30 = vrot.slane %v3343_v3, %v123_v25  ;;  %v2983_v25 = vld [vmem:[#allocation11 + $0x8] sm:$0xff]  }
 0x1bb   :  { %1636 = vmatprep.subr.bf16.mxu0 %v2910_v32  ;;  %v2978_v32 = vld [vmem:[#allocation9 + $0xb0] sm:$0xff]  }
 0x1bd   :  { %1628 = vmatmul.mubr.bf16.vlgmr.msra.gmra.mrb[8].mxu0 %v3316_v35  ;;  %v2923_v35 = vld [vmem:[#allocation8 + $0x400] ss:$24 sps:$4 sm:$0xff]  }
 0x1be   :  { %1637 = vmatpush1.bf16.msra.mxu0 %v2908_v33  ;;  %1668 = vmatprep.mubr.bf16.mxu0 %v3320_v38  ;;  %v2928_v38 = vld [vmem:[#allocation8 + $0x434] ss:$24 sps:$4 sm:$0xff]  }
 0x1bf   :  { %1638 = vmatprep.subr.bf16.mxu0 %v2913_v34  ;;  %v2979_v34 = vld [vmem:[#allocation9 + $0xb8] sm:$0xff]  }
 0x1c2   :  { %1639 = vmatpush1.bf16.msra.mxu0 %v2911_v36 }
 0x1c3   :  { %1640 = vmatprep.subr.bf16.mxu0 %v2916_v37  ;;  %v2980_v37 = vld [vmem:[#allocation11 + $0x40] sm:$0xff]  }
 0x1c6   :  { %1641 = vmatpush1.bf16.msra.mxu0 %v2914_v39  ;;  %v2981_v39 = vld [vmem:[#allocation11] sm:$0xff]  }
 0x1c7   :  { %1642 = vmatprep.subr.bf16.mxu0 %v2919_v40 }
 0x1ca   :  { %1643 = vmatpush1.bf16.msra.mxu0 %v2917_v41  ;;  %v2982_v41 = vld [vmem:[#allocation11 + $0x48] sm:$0xff]  }
 0x1cb   :  { %1644 = vmatprep.subr.bf16.mxu0 %v2922_v42  ;;  %v2984_v42 = vld [vmem:[#allocation11 + $0x50] sm:$0xff]  }
 0x1ce   :  { %1645 = vmatpush1.bf16.msra.mxu0 %v2920_v43  ;;  %v2985_v43 = vld [vmem:[#allocation11 + $0x10] sm:$0xff]  }
 0x1cf   :  { %1646 = vmatprep.subr.bf16.mxu0 %v2925_v12  ;;  %v2986_v12 = vld [vmem:[#allocation11 + $0x58] sm:$0xff]  }
 0x1d2   :  { %1647 = vmatpush1.bf16.msra.mxu0 %v2923_v35  ;;  %v2987_v35 = vld [vmem:[#allocation11 + $0x18] sm:$0xff]  }
 0x1d3   :  { %1648 = vmatprep.subr.bf16.mxu0 %v2928_v38  ;;  %v2989_v38 = vld [vmem:[#allocation11 + $0x20] sm:$0xff]  }
 0x1d6   :  { %1649 = vmatpush1.bf16.msra.mxu0 %v2926_v23  ;;  %v2991_v23 = vld [vmem:[#allocation11 + $0x28] sm:$0xff]  }
 0x1d7   :  { %1650 = vmatprep.subr.bf16.mxu0 %v2931_v48  ;;  %v2993_v48 = vld [vmem:[#allocation11 + $0x30] sm:$0xff]  }
 0x1da   :  { %1651 = vmatpush1.bf16.msra.mxu0 %v2929_v50  ;;  %v2995_v50 = vld [vmem:[#allocation11 + $0x38] sm:$0xff]  }
 0x1db   :  { %1652 = vmatprep.subr.bf16.mxu0 %v2934_v51  ;;  %v459_v51 = vsub.s32 4, %v3293_v10 }
 0x1de   :  { %1653 = vmatpush1.bf16.msra.mxu0 %v2932_v53  ;;  %v456_v53 = vrot.slane %v3343_v3, %v127_v14  ;;  %v2998_v14 = vld [vmem:[#allocation11 + $0x90] sm:$0xff]  }
 0x1df   :  { %1654 = vmatprep.subr.bf16.mxu0 %v2937_v54  ;;  %v460_v54 = vrot.slane %v3343_v3, %v459_v51 }
 0x1e2   :  { %1655 = vmatpush1.bf16.msra.mxu0 %v2935_v55 }
 0x1e3   :  { %1656 = vmatprep.subr.bf16.mxu0 %v2940_v56 }
 0x1e6   :  { %1657 = vmatpush1.bf16.msra.mxu0 %v2938_v57 }
 0x1e7   :  { %1658 = vmatprep.subr.bf16.mxu0 %v2943_v58 }
 0x1ea   :  { %1659 = vmatpush1.bf16.msra.mxu0 %v2941_v59 }
 0x1eb   :  { %1660 = vmatprep.subr.bf16.mxu0 %v2946_v31 }
 0x1ee   :  { %1661 = vmatpush1.bf16.msra.mxu0 %v2944_v60 }
 0x1ef   :  { %1662 = vmatprep.subr.bf16.mxu0 %v2949_v61 }
 0x1f2   :  { %1663 = vmatpush1.bf16.msra.mxu0 %v2947_v62 }
 0x1f3   :  { %1664 = vmatprep.subr.bf16.mxu0 %v2952_v63  ;;  %v2996_v63 = vld [vmem:[#allocation11 + $0x80] sm:$0xff]  }
 0x1f6   :  { %1665 = vmatpush1.bf16.msra.mxu0 %v2950_v0 }
 0x1f7   :  { %1666 = vmatprep.subr.bf16.mxu0 %v2955_v1  ;;  %v2997_v1 = vld [vmem:[#allocation11 + $0x88] sm:$0xff]  }
 0x1fa   :  { %1667 = vmatpush1.bf16.msra.mxu0 %v2953_v2  ;;  %v2999_v2 = vld [vmem:[#allocation11 + $0x98] sm:$0xff]  }
 0x1fd   :  { %1669 = vmatmul.mubr.bf16.vlgmr.msra.gmra.mrb[8].mxu0 %v3331_v46 }
 0x250   :  { %v1506_v6 = vpop.f32.mrb[4].mxu0  ;;  %v1588_v7 = vpop.f32.mrb[4].mxu1 }
 0x251   :  { %v2629_v8 = vadd.f32 %v1506_v6, %v444_v4  ;;  %v1508_v9 = vpop.f32.mrb[5].mxu0  ;;  %v3351_v15 = vpop.f32.mrb[5].mxu1  ;;  %v2631_v33 = vadd.f32 %v1588_v7, %v452_v30  ;;  %v3000_v4 = vld [vmem:[#allocation11 + $0xa0] sm:$0xff]   ;;  %v3001_v6 = vld [vmem:[#allocation11 + $0xa8] sm:$0xff]  }
 0x252   :  { %v2630_v46 = vadd.f32 %v1508_v9, %v448_v5  ;;  %v1510_v16 = vpop.f32.mrb[6].mxu0  ;;  %v1592_v17 = vpop.f32.mrb[6].mxu1  ;;  %v2632_v55 = vadd.f32 %v3351_v15, %v456_v53  ;;  %v463_v5 = vsub.s32 5, %v3293_v10  ;;  %v3003_v15 = vld [vmem:[#allocation11 + $0xb8] sm:$0xff]  }
 0x253   :  { %v1677_v18 = vmax.f32 %v2629_v8, 0.0  ;;  %v1511_v19 = vpop.f32.mrb[7].mxu0  ;;  %v1593_v20 = vpop.f32.mrb[7].mxu1  ;;  %v1679_v36 = vmax.f32 %v2631_v33, 0.0  ;;  %v3002_v8 = vld [vmem:[#allocation11 + $0xb0] sm:$0xff]  }
 0x254   :  { %v1678_v21 = vmax.f32 %v2630_v46, 0.0  ;;  %v1680_v59 = vmax.f32 %v2632_v55, 0.0  ;;  %v464_v7 = vrot.slane %v3343_v3, %v463_v5  ;;  %v2477_v20 = vld [vmem:[%s3411_s7] ss:$0 sm:$0xff] }
 0x255   :  { %v1683_v11 = vpack.c.bf16 %v1677_v18, %v1677_v18  ;;  %v1685_v40 = vpack.c.bf16 %v1679_v36, %v1679_v36  ;;  %v2502_v36 = vld [vmem:[%s3413_s9] ss:$0 sm:$0xff] }
 0x256   :  { %v1684_v22 = vpack.c.bf16 %v1678_v21, %v1678_v21  ;;  %v1686_v0 = vpack.c.bf16 %v1680_v59, %v1680_v59 }
 0x258   :  { %1920 = vmatprep.mubr.bf16.mxu1 %v1684_v22 }
 0x259   :  { %1921 = vmatmul.mubr.bf16.vlgmr.msra.gmra.mrb[8].mxu1 %v1683_v11 }
 0x25a   :  { %2590 = vmatpush3.bf16.msra.mxu1 %v2972_v24  ;;  %2605 = vmatprep.mubr.msk.bf16.mxu1 %vm3163_vm1, %v3162_v52 }
 0x25b   :  { %2591 = vmatprep.subr.bf16.mxu1 %v3162_v52 }
 0x25e   :  { %2592 = vmatpush3.bf16.msra.mxu1 %v2973_v13 }
 0x25f   :  { %2593 = vmatprep.subr.bf16.mxu1 %v3162_v52 }
 0x262   :  { %2594 = vmatpush3.bf16.msra.mxu1 %v2974_v26 }
 0x263   :  { %2595 = vmatprep.subr.bf16.mxu1 %v3162_v52 }
 0x266   :  { %2596 = vmatpush3.bf16.msra.mxu1 %v2975_v27 }
 0x267   :  { %2597 = vmatprep.subr.bf16.mxu1 %v3162_v52 }
 0x26a   :  { %2598 = vmatpush3.bf16.msra.mxu1 %v2976_v28 }
 0x26b   :  { %2599 = vmatprep.subr.bf16.mxu1 %v3162_v52 }
 0x26e   :  { %2600 = vmatpush3.bf16.msra.mxu1 %v2977_v29 }
 0x26f   :  { %2601 = vmatprep.subr.bf16.mxu1 %v3162_v52 }
 0x272   :  { %2602 = vmatpush3.bf16.msra.mxu1 %v2978_v32 }
 0x273   :  { %2603 = vmatprep.subr.bf16.mxu1 %v3162_v52 }
 0x276   :  { %2604 = vmatpush3.bf16.msra.mxu1 %v2979_v34 }
 0x277   :  { %2558 = vmatprep.subr.bf16.mxu1 %v2980_v37 }
 0x279   :  { %2606 = vmatmul.mubr.bf16.vlgmr.msra.gmra.mrb[12].mxu1 %v1685_v40 }
 0x27a   :  { %2559 = vmatpush3.bf16.msra.mxu1 %v2981_v39 }
 0x27b   :  { %2560 = vmatprep.subr.bf16.mxu1 %v2982_v41 }
 0x27e   :  { %2561 = vmatpush3.bf16.msra.mxu1 %v2983_v25 }
 0x27f   :  { %2562 = vmatprep.subr.bf16.mxu1 %v2984_v42 }
 0x282   :  { %2563 = vmatpush3.bf16.msra.mxu1 %v2985_v43 }
 0x283   :  { %2564 = vmatprep.subr.bf16.mxu1 %v2986_v12 }
 0x286   :  { %2565 = vmatpush3.bf16.msra.mxu1 %v2987_v35 }
 0x287   :  { %2566 = vmatprep.subr.bf16.mxu1 %v2988_v44 }
 0x28a   :  { %2567 = vmatpush3.bf16.msra.mxu1 %v2989_v38 }
 0x28b   :  { %2568 = vmatprep.subr.bf16.mxu1 %v2990_v45 }
 0x28e   :  { %2569 = vmatpush3.bf16.msra.mxu1 %v2991_v23 }
 0x28f   :  { %2570 = vmatprep.subr.bf16.mxu1 %v2992_v47 }
 0x292   :  { %2571 = vmatpush3.bf16.msra.mxu1 %v2993_v48 }
 0x293   :  { %2572 = vmatprep.subr.bf16.mxu1 %v2994_v49 }
 0x296   :  { %2573 = vmatpush3.bf16.msra.mxu1 %v2995_v50 }
 0x297   :  { %2609 = vmatprep.subr.bf16.mxu1 %v3162_v52 }
 0x2d0   :  { %v1670_v56 = vpop.f32.mrb[8].mxu0 }
 0x2d1   :  { %v2633_v57 = vadd.f32 %v1670_v56, %v460_v54  ;;  %v1672_v58 = vpop.f32.mrb[9].mxu0 }
 0x2d2   :  { %v1674_v31 = vpop.f32.mrb[10].mxu0  ;;  %v2634_v9 = vadd.f32 %v1672_v58, %v464_v7 }
 0x2d3   :  { %v1681_v60 = vmax.f32 %v2633_v57, 0.0  ;;  %v1675_v61 = vpop.f32.mrb[11].mxu0 }
 0x2d4   :  { %v1682_v46 = vmax.f32 %v2634_v9, 0.0 }
 0x2d5   :  { %v1687_v62 = vpack.c.bf16 %v1681_v60, %v1681_v60 }
 0x2d6   :  { %v1688_v10 = vpack.c.bf16 %v1682_v46, %v1682_v46 }
 0x2d7   :  { %2202 = vmatprep.mubr.bf16.mxu1 %v1687_v62 }
 0x2d8   :  { %2203 = vmatmul.mubr.bf16.vlgmr.msra.gmra.mrb[16].mxu1 %v1686_v0 }
 0x2d9   :  { %2610 = vmatpush3.bf16.msra.mxu1 %v2996_v63  ;;  %2625 = vmatprep.mubr.msk.bf16.mxu1 %vm3163_vm1, %v3162_v52 }
 0x2da   :  { %2611 = vmatprep.subr.bf16.mxu1 %v3162_v52 }
 0x2dd   :  { %2612 = vmatpush3.bf16.msra.mxu1 %v2997_v1 }
 0x2de   :  { %2613 = vmatprep.subr.bf16.mxu1 %v3162_v52 }
 0x2e1   :  { %2614 = vmatpush3.bf16.msra.mxu1 %v2998_v14 }
 0x2e2   :  { %2615 = vmatprep.subr.bf16.mxu1 %v3162_v52 }
 0x2e5   :  { %2616 = vmatpush3.bf16.msra.mxu1 %v2999_v2 }
 0x2e6   :  { %2617 = vmatprep.subr.bf16.mxu1 %v3162_v52 }
 0x2e9   :  { %2618 = vmatpush3.bf16.msra.mxu1 %v3000_v4 }
 0x2ea   :  { %2619 = vmatprep.subr.bf16.mxu1 %v3162_v52 }
 0x2ed   :  { %2620 = vmatpush3.bf16.msra.mxu1 %v3001_v6 }
 0x2ee   :  { %2621 = vmatprep.subr.bf16.mxu1 %v3162_v52 }
 0x2f1   :  { %2622 = vmatpush3.bf16.msra.mxu1 %v3002_v8 }
 0x2f2   :  { %2623 = vmatprep.subr.bf16.mxu1 %v3162_v52  ;;  %v1969_v52 = vstv %s3404_s0  ;;  %s3164_s0 = smov [#allocation12]  }
 0x2f3   :  { %s2268_s20 = sshll.u32 %s3164_s0, 4  ;;  %s2269_s20 = int_to_ptr.vmem [resolvable:$true] %s2268_s20 }
 0x2f4   :  { %s3120_s9 = scalar_lea.vmem %s2269_s20, 256  ;;  %p3125_p13 = scmp.lt.s32.totalorder %s2269_s20, %s2269_s20 }
 0x2f5   :  { %2624 = vmatpush3.bf16.msra.mxu1 %v3003_v15  ;;  %p3121_p12 = scmp.ne.s32.totalorder %s2269_s20, %s3120_s9  ;;  %p3126_p0 = scmp.lt.s32.totalorder %s3120_s9, %s3120_s9 }
 0x2f7   :  { %p3127_p1 = por %p3126_p0, %p3125_p13 }
 0x2f8   :  { %2626 = vmatmul.mubr.bf16.vlgmr.msra.gmra.mrb[20].mxu1 %v1688_v10 }
 0x2f9   :  { %p3128_p2 = pnand %p3127_p1, %p3121_p12 }
 0x32c   :  { %v2543_v16 = vpop.f32.mrb[8].mxu1 }
 0x32d   :  { %v2544_v17 = vpop.f32.mrb[9].mxu1 }
 0x32e   :  { %v2545_v18 = vadd.f32 %v2544_v17, %v2543_v16  ;;  %v2546_v19 = vpop.f32.mrb[10].mxu1 }
 0x32f   :  { %v2547_v3 = vpop.f32.mrb[11].mxu1 }
 0x330   :  { %v1923_v21 = vadd.f32 %v2545_v18, %v2477_v20 }
 0x34c   :  { %v1962_v22 = vpop.f32.mrb[12].mxu1 }
 0x34d   :  { %v1963_v24 = vadd.f32 %v1962_v22, %v1923_v21  ;;  %v2607_v11 = vpop.f32.mrb[13].mxu1 }
 0x34e   :  { %v1965_v13 = vpop.f32.mrb[14].mxu1 }
 0x34f   :  { %3004 = vtanh.f32 %v1963_v24  ;;  %v2608_v26 = vpop.f32.mrb[15].mxu1 }
 0x359   :  { %v3005_v27 = vpop.eup %3004 }
 0x35a   :  { %v1970_v28 = vmul.f32 %v3005_v27, %v1969_v52 }
 0x35c   :  { %2260 = vst [vmem:[#allocation12] sm:$0xff] %v1970_v28 }
 0x3ab   :  { %v2574_v29 = vpop.f32.mrb[16].mxu1 }
 0x3ac   :  { %v2575_v30 = vpop.f32.mrb[17].mxu1 }
 0x3ad   :  { %v2576_v32 = vadd.f32 %v2575_v30, %v2574_v29  ;;  %v2577_v33 = vpop.f32.mrb[18].mxu1 }
 0x3ae   :  { %v2578_v34 = vpop.f32.mrb[19].mxu1 }
 0x3af   :  { %v2205_v37 = vadd.f32 %v2576_v32, %v2502_v36 }
 0x3cb   :  { %v2244_v39 = vpop.f32.mrb[20].mxu1 }
 0x3cc   :  { %v2245_v40 = vadd.f32 %v2244_v39, %v2205_v37  ;;  %v2627_v41 = vpop.f32.mrb[21].mxu1 }
 0x3cd   :  { %v2247_v25 = vpop.f32.mrb[22].mxu1 }
 0x3ce   :  { %v2628_v42 = vpop.f32.mrb[23].mxu1  ;;  %2250 = vmax.xlane.f32.xlu0 %v2245_v40 }
 0x45b   :  { %v2251_v43 = vpop.xlane.xlu0 %2250 }
 0x45c   :  { %v2252_v12 = vsub.f32 %v2245_v40, %v2251_v43 }
 0x45e   :  { %v2253_v35 = vmul.f32 1.442695, %v2252_v12 }
 0x460   :  { %3006 = vpow2.f32 %v2253_v35 }
 0x46a   :  { %v3007_v44 = vpop.eup %3006 }
 0x46b   :  { %2255 = vadd.xlane.f32.xlu0 %v3007_v44 }
 0x4f8   :  { %v2256_v38 = vpop.xlane.xlu0 %2255 }
 0x4f9   :  { %3008 = vlog2.f32 %v2256_v38 }
 0x503   :  { %v3009_v45 = vpop.eup %3008 }
 0x504   :  { %v2258_v23 = vmul.f32 0.6931472, %v3009_v45 }
 0x506   :  { %v2259_v47 = vsub.f32 %v2252_v12, %v2258_v23 }
 0x508   :  { %2261 = vst [vmem:[#allocation12 + $0x8] sm:$0xff] %v2259_v47 }
 0x509   :  { %3131 = shalt.err (!%p3128_p2)
}
 0x50a   :  { %s3132_s21 = scalar_lea.hbm %s3414_s10, 256 }
 0x50b   :  { %p3133_p3 = scmp.ne.s32.totalorder %s3414_s10, %s3132_s21  ;;  %p3136_p4 = scmp.lt.u32.totalorder %s3132_s21, %s3414_s10 }
 0x50d   :  { %p3138_p5 = pnand %p3136_p4, %p3133_p3 }
 0x50f   :  { %3141 = shalt.err (!%p3138_p5)
}
 0x510   :  { %2271 = dma.vmem_to_hbm [thread:$0]  %s2269_s20, 256, %s3414_s10, [#allocation5]  }
 0x511   :  { %3148 = dma.done.wait [#allocation5], 256  }
 0x512   :  { %3149 = vsyncadd [#allocation5], 4294967040 }
 0x513   :  { %2275 = vsyncpa [#allocation4], 1 }
 0x514   :  { %2276 = vsyncpa [#allocation7], 1 }
 0x515   :  { %2277 = vsyncpa [#allocation10], 1 }
 0x516   :  { %2278 = vsyncpa [#allocation5], 1 }

</bundles_post_ra>
